<compile_context>
chip_gen: v6e
topology: v6e:2x2x1
jax: 0.10.0
libtpu: 0.0.40
codegen_flags: <defaults>
</compile_context>

<pallas_src>
import functools

import jax
import jax.numpy as jnp
from jax.experimental import pallas as pl
from jax.experimental.pallas import tpu as pltpu


# ----------------------------- fused kernel ---------------------------------

def make_sepconv_kernel(K, pad, W, lanes):
    """Kernel over one lane-block. Activations are (C, lanes) f32 with
    lanes = B_blk * H * W (whole batch elements folded onto the lane axis)."""

    # Flat lane offset of every depthwise tap (di, dj) in row-major order.
    offsets = [(di - pad) * W + (dj - pad) for di in range(K) for dj in range(K)]

    def dwconv(h, wm_ref):
        # Depthwise KxK conv, stride 1, zero 'same' padding.
        # h: (C, lanes) f32.  wm_ref: (K*K, C, lanes) masked lane-replicated
        # weights (zero on out-of-image lanes), resident in VMEM.
        # Rolls wrapping across image / batch-element boundaries read lanes
        # whose masked weight is exactly zero, so wrap-around is harmless.
        acc = None
        for t, d in enumerate(offsets):
            shifted = h if d == 0 else pltpu.roll(h, shift=(-d) % lanes, axis=1)
            term = shifted * wm_ref[t]
            acc = term if acc is None else acc + term
        return acc

    def kernel(x_ref, wm1_ref, wpw1_ref, wm2_ref, wpw2_ref, o_ref):
        x = x_ref[...].astype(jnp.float32)                      # (C_in, lanes)
        h = dwconv(x, wm1_ref)                                  # depthwise KxK
        # 1x1 convs on the MXU (f32 accumulate, HIGHEST precision so the
        # result holds the 1e-3 check against the f32 reference).
        h = jnp.dot(wpw1_ref[...], h,
                    preferred_element_type=jnp.float32,
                    precision=jax.lax.Precision.HIGHEST)        # (C_in, lanes)
        h = jnp.maximum(h, 0.0)                                 # ReLU
        h = dwconv(h, wm2_ref)                                  # depthwise KxK
        out = jnp.dot(wpw2_ref[...], h,
                      preferred_element_type=jnp.float32,
                      precision=jax.lax.Precision.HIGHEST)      # (C_out, lanes)
        o_ref[...] = out.astype(o_ref.dtype)

    return kernel


# ----------------------- masked depthwise weights ----------------------------

def _masked_dw_weights(w_dw, H, W, K, pad, b_blk):
    """Fold the zero-padding boundary masks into lane-replicated depthwise
    weights:  wm[t, c, n] = w_dw[c, t] * mask_t[n],  n over b_blk*H*W lanes."""
    HW = H * W
    n = jnp.arange(HW, dtype=jnp.int32)
    row, col = n // W, n % W
    masks = []
    for di in range(K):
        r = di - pad
        for dj in range(K):
            s = dj - pad
            masks.append((row + r >= 0) & (row + r < H) &
                         (col + s >= 0) & (col + s < W))
    mask = jnp.stack(masks, 0).astype(jnp.float32)        # (K*K, HW)
    mask = jnp.tile(mask, (1, b_blk))                      # (K*K, b_blk*HW)
    return w_dw.T[:, :, None] * mask[:, None, :]           # (K*K, C, b_blk*HW)


def _num_lane_blocks(B, HW):
    # 2-way "parallel" lane-split only on chips with 2 TensorCores (v7x);
    # a single grid step amortizes per-step overhead best on v5e/v6e (1 TC).
    try:
        kind = jax.devices()[0].device_kind.lower()
    except Exception:
        kind = ""
    if "v7" in kind and B % 2 == 0 and ((B // 2) * HW) % 128 == 0:
        return 2
    return 1


# ------------------------------- wrapper -------------------------------------

def sepconv_forward(x_nchw, params, *, kernel_size, stride, padding):
    # TODO(synk): stride > 1 / non-'same' padding are not implemented in the
    # fused flat (C, B*H*W) layout; common DRSformer usage is stride=1,
    # padding=kernel_size//2 — guard call sites.
    assert stride == 1
    assert kernel_size % 2 == 1 and padding == kernel_size // 2

    B, C_in, H, W = x_nchw.shape
    C_out = params['pw2'].shape[0]
    HW = H * W
    K = kernel_size
    KK = K * K

    nblk = _num_lane_blocks(B, HW)
    b_blk = B // nblk
    lanes = b_blk * HW

    # Fold the whole batch onto the 128-lane axis: (B, C, H, W) -> (C, B*HW).
    x_flat = jnp.transpose(x_nchw, (1, 0, 2, 3)).reshape(C_in, B * HW)

    # Boundary masks pre-folded into lane-replicated depthwise weights; these
    # stay resident in VMEM across the (tiny) grid.
    wm1 = _masked_dw_weights(params['dw1'], H, W, K, padding, b_blk)
    wm2 = _masked_dw_weights(params['dw2'], H, W, K, padding, b_blk)

    kern = make_sepconv_kernel(K, padding, W, lanes)

    out = pl.pallas_call(
        kern,
        out_shape=jax.ShapeDtypeStruct((C_out, B * HW), x_nchw.dtype),
        grid=(nblk,),
        in_specs=[
            pl.BlockSpec((C_in, lanes), lambda i: (0, i)),
            pl.BlockSpec((KK, C_in, lanes), lambda i: (0, 0, 0)),
            pl.BlockSpec((C_in, C_in), lambda i: (0, 0)),
            pl.BlockSpec((KK, C_in, lanes), lambda i: (0, 0, 0)),
            pl.BlockSpec((C_out, C_in), lambda i: (0, 0)),
        ],
        out_specs=pl.BlockSpec((C_out, lanes), lambda i: (0, i)),
        compiler_params=pltpu.CompilerParams(
            dimension_semantics=("parallel",)),
    )(x_flat, wm1, params['pw1'], wm2, params['pw2'])

    return jnp.transpose(out.reshape(C_out, B, H, W), (1, 0, 2, 3))


# --------------------------- params & reference ------------------------------

def init_params(key, C_in, C_out, kernel_size):
    KK = kernel_size * kernel_size
    ks = jax.random.split(key, 4)
    sc = 0.3
    return {
        # depthwise weights: dw[c, ky*K + kx] == torch_w[c, 0, ky, kx]
        'dw1': sc * jax.random.normal(ks[0], (C_in, KK), jnp.float32),
        # pointwise weights stored as (Cout, Cin): y = W @ x
        'pw1': sc * jax.random.normal(ks[1], (C_in, C_in), jnp.float32),
        'dw2': sc * jax.random.normal(ks[2], (C_in, KK), jnp.float32),
        'pw2': sc * jax.random.normal(ks[3], (C_out, C_in), jnp.float32),
    }


def sepconv_reference(x, params, kernel_size, stride, padding):
    C_in = x.shape[1]
    C_out = params['pw2'].shape[0]
    K = kernel_size
    dn = ('NCHW', 'OIHW', 'NCHW')
    hi = jax.lax.Precision.HIGHEST
    pads = ((padding, padding), (padding, padding))
    w_dw1 = params['dw1'].reshape(C_in, 1, K, K)
    w_pw1 = params['pw1'].reshape(C_in, C_in, 1, 1)
    w_dw2 = params['dw2'].reshape(C_in, 1, K, K)
    w_pw2 = params['pw2'].reshape(C_out, C_in, 1, 1)
    y = jax.lax.conv_general_dilated(x, w_dw1, (stride, stride), pads,
                                     feature_group_count=C_in,
                                     dimension_numbers=dn, precision=hi)
    y = jax.lax.conv_general_dilated(y, w_pw1, (1, 1), 'VALID',
                                     dimension_numbers=dn, precision=hi)
    y = jnp.maximum(y, 0.0)
    y = jax.lax.conv_general_dilated(y, w_dw2, (1, 1), pads,
                                     feature_group_count=C_in,
                                     dimension_numbers=dn, precision=hi)
    y = jax.lax.conv_general_dilated(y, w_pw2, (1, 1), 'VALID',
                                     dimension_numbers=dn, precision=hi)
    return y


# --------------------------------- main ---------------------------------------

if __name__ == "__main__":
    key = jax.random.PRNGKey(0)
    B, C_in, C_out, H, W = 2, 16, 32, 16, 16
    kernel_size, stride, padding = 3, 1, 1

    params = init_params(key, C_in, C_out, kernel_size)
    x = jax.random.normal(jax.random.fold_in(key, 1),
                          (B, C_in, H, W), jnp.float32)

    fwd = jax.jit(functools.partial(sepconv_forward, kernel_size=kernel_size,
                                    stride=stride, padding=padding))
    out = jax.block_until_ready(fwd(x, params))

    ref = sepconv_reference(x, params, kernel_size, stride, padding)
    assert out.shape == (B, C_out, H, W)
    assert bool(jnp.all(jnp.isfinite(out)))
    max_err = float(jnp.max(jnp.abs(out - ref)))
    assert max_err < 1e-3, f"max abs error vs reference: {max_err}"
    print("KERNEL_OK")
</pallas_src>

<mosaic_0001>
module attributes {stable_mosaic.version = 11 : i64} {
  func.func @kernel(%arg0: i32, %arg1: memref<16x512xf32, #tpu.memory_space<vmem>>, %arg2: memref<9x16x512xf32, #tpu.memory_space<vmem>>, %arg3: memref<16x16xf32, #tpu.memory_space<vmem>>, %arg4: memref<9x16x512xf32, #tpu.memory_space<vmem>>, %arg5: memref<32x16xf32, #tpu.memory_space<vmem>>, %arg6: memref<32x512xf32, #tpu.memory_space<vmem>>) attributes {dimension_semantics = [#tpu.dimension_semantics<parallel>], iteration_bounds = array<i64: 1>, scalar_prefetch = 0 : i64, scratch_operands = 0 : i64, tpu.core_type = #tpu.core_type<tc>, window_params = [{transform_indices = @transform_0, window_bounds = array<i64: 16, 512>}, {pipeline_mode = #tpu.pipeline_mode<synchronous>, transform_indices = @transform_1, window_bounds = array<i64: 9, 16, 512>}, {pipeline_mode = #tpu.pipeline_mode<synchronous>, transform_indices = @transform_2, window_bounds = array<i64: 16, 16>}, {pipeline_mode = #tpu.pipeline_mode<synchronous>, transform_indices = @transform_3, window_bounds = array<i64: 9, 16, 512>}, {pipeline_mode = #tpu.pipeline_mode<synchronous>, transform_indices = @transform_4, window_bounds = array<i64: 32, 16>}, {transform_indices = @transform_5, window_bounds = array<i64: 32, 512>}]} {
    %c0 = arith.constant 0 : index
    %c0_0 = arith.constant 0 : index
    %0 = vector.load %arg1[%c0, %c0_0] : memref<16x512xf32, #tpu.memory_space<vmem>>, vector<16x512xf32>
    %c17_i32 = arith.constant 17 : i32
    %1 = tpu.dynamic_rotate %0 by %c17_i32 dim 1 : vector<16x512xf32>, i32 -> vector<16x512xf32>
    %c0_1 = arith.constant 0 : index
    %c0_2 = arith.constant 0 : index
    %c0_3 = arith.constant 0 : index
    %2 = vector.load %arg2[%c0_1, %c0_2, %c0_3] : memref<9x16x512xf32, #tpu.memory_space<vmem>>, vector<1x16x512xf32>
    %3 = vector.shape_cast %2 : vector<1x16x512xf32> to vector<16x512xf32>
    %4 = arith.mulf %1, %3 : vector<16x512xf32>
    %c16_i32 = arith.constant 16 : i32
    %5 = tpu.dynamic_rotate %0 by %c16_i32 dim 1 : vector<16x512xf32>, i32 -> vector<16x512xf32>
    %c1 = arith.constant 1 : index
    %c0_4 = arith.constant 0 : index
    %c0_5 = arith.constant 0 : index
    %6 = vector.load %arg2[%c1, %c0_4, %c0_5] : memref<9x16x512xf32, #tpu.memory_space<vmem>>, vector<1x16x512xf32>
    %7 = vector.shape_cast %6 : vector<1x16x512xf32> to vector<16x512xf32>
    %8 = arith.mulf %5, %7 : vector<16x512xf32>
    %9 = arith.addf %4, %8 : vector<16x512xf32>
    %c15_i32 = arith.constant 15 : i32
    %10 = tpu.dynamic_rotate %0 by %c15_i32 dim 1 : vector<16x512xf32>, i32 -> vector<16x512xf32>
    %c2 = arith.constant 2 : index
    %c0_6 = arith.constant 0 : index
    %c0_7 = arith.constant 0 : index
    %11 = vector.load %arg2[%c2, %c0_6, %c0_7] : memref<9x16x512xf32, #tpu.memory_space<vmem>>, vector<1x16x512xf32>
    %12 = vector.shape_cast %11 : vector<1x16x512xf32> to vector<16x512xf32>
    %13 = arith.mulf %10, %12 : vector<16x512xf32>
    %14 = arith.addf %9, %13 : vector<16x512xf32>
    %c1_i32 = arith.constant 1 : i32
    %15 = tpu.dynamic_rotate %0 by %c1_i32 dim 1 : vector<16x512xf32>, i32 -> vector<16x512xf32>
    %c3 = arith.constant 3 : index
    %c0_8 = arith.constant 0 : index
    %c0_9 = arith.constant 0 : index
    %16 = vector.load %arg2[%c3, %c0_8, %c0_9] : memref<9x16x512xf32, #tpu.memory_space<vmem>>, vector<1x16x512xf32>
    %17 = vector.shape_cast %16 : vector<1x16x512xf32> to vector<16x512xf32>
    %18 = arith.mulf %15, %17 : vector<16x512xf32>
    %19 = arith.addf %14, %18 : vector<16x512xf32>
    %c4 = arith.constant 4 : index
    %c0_10 = arith.constant 0 : index
    %c0_11 = arith.constant 0 : index
    %20 = vector.load %arg2[%c4, %c0_10, %c0_11] : memref<9x16x512xf32, #tpu.memory_space<vmem>>, vector<1x16x512xf32>
    %21 = vector.shape_cast %20 : vector<1x16x512xf32> to vector<16x512xf32>
    %22 = arith.mulf %0, %21 : vector<16x512xf32>
    %23 = arith.addf %19, %22 : vector<16x512xf32>
    %c511_i32 = arith.constant 511 : i32
    %24 = tpu.dynamic_rotate %0 by %c511_i32 dim 1 : vector<16x512xf32>, i32 -> vector<16x512xf32>
    %c5 = arith.constant 5 : index
    %c0_12 = arith.constant 0 : index
    %c0_13 = arith.constant 0 : index
    %25 = vector.load %arg2[%c5, %c0_12, %c0_13] : memref<9x16x512xf32, #tpu.memory_space<vmem>>, vector<1x16x512xf32>
    %26 = vector.shape_cast %25 : vector<1x16x512xf32> to vector<16x512xf32>
    %27 = arith.mulf %24, %26 : vector<16x512xf32>
    %28 = arith.addf %23, %27 : vector<16x512xf32>
    %c497_i32 = arith.constant 497 : i32
    %29 = tpu.dynamic_rotate %0 by %c497_i32 dim 1 : vector<16x512xf32>, i32 -> vector<16x512xf32>
    %c6 = arith.constant 6 : index
    %c0_14 = arith.constant 0 : index
    %c0_15 = arith.constant 0 : index
    %30 = vector.load %arg2[%c6, %c0_14, %c0_15] : memref<9x16x512xf32, #tpu.memory_space<vmem>>, vector<1x16x512xf32>
    %31 = vector.shape_cast %30 : vector<1x16x512xf32> to vector<16x512xf32>
    %32 = arith.mulf %29, %31 : vector<16x512xf32>
    %33 = arith.addf %28, %32 : vector<16x512xf32>
    %c496_i32 = arith.constant 496 : i32
    %34 = tpu.dynamic_rotate %0 by %c496_i32 dim 1 : vector<16x512xf32>, i32 -> vector<16x512xf32>
    %c7 = arith.constant 7 : index
    %c0_16 = arith.constant 0 : index
    %c0_17 = arith.constant 0 : index
    %35 = vector.load %arg2[%c7, %c0_16, %c0_17] : memref<9x16x512xf32, #tpu.memory_space<vmem>>, vector<1x16x512xf32>
    %36 = vector.shape_cast %35 : vector<1x16x512xf32> to vector<16x512xf32>
    %37 = arith.mulf %34, %36 : vector<16x512xf32>
    %38 = arith.addf %33, %37 : vector<16x512xf32>
    %c495_i32 = arith.constant 495 : i32
    %39 = tpu.dynamic_rotate %0 by %c495_i32 dim 1 : vector<16x512xf32>, i32 -> vector<16x512xf32>
    %c8 = arith.constant 8 : index
    %c0_18 = arith.constant 0 : index
    %c0_19 = arith.constant 0 : index
    %40 = vector.load %arg2[%c8, %c0_18, %c0_19] : memref<9x16x512xf32, #tpu.memory_space<vmem>>, vector<1x16x512xf32>
    %41 = vector.shape_cast %40 : vector<1x16x512xf32> to vector<16x512xf32>
    %42 = arith.mulf %39, %41 : vector<16x512xf32>
    %43 = arith.addf %38, %42 : vector<16x512xf32>
    %c0_20 = arith.constant 0 : index
    %c0_21 = arith.constant 0 : index
    %44 = vector.load %arg3[%c0_20, %c0_21] : memref<16x16xf32, #tpu.memory_space<vmem>>, vector<16x16xf32>
    %cst = arith.constant dense<0.000000e+00> : vector<16x512xf32>
    %45 = tpu.matmul %44, %43, %cst {dimension_numbers = #tpu.dot_dimension_numbers<[1], [0], [0], [1], [0, 0, 1, 1], [], []>, precision = #tpu.contract_precision<fp32>} : vector<16x16xf32>, vector<16x512xf32>, vector<16x512xf32> -> vector<16x512xf32>
    %cst_22 = arith.constant 0.000000e+00 : f32
    %46 = vector.broadcast %cst_22 : f32 to vector<16x512xf32>
    %47 = arith.maximumf %45, %46 : vector<16x512xf32>
    %c17_i32_23 = arith.constant 17 : i32
    %48 = tpu.dynamic_rotate %47 by %c17_i32_23 dim 1 : vector<16x512xf32>, i32 -> vector<16x512xf32>
    %c0_24 = arith.constant 0 : index
    %c0_25 = arith.constant 0 : index
    %c0_26 = arith.constant 0 : index
    %49 = vector.load %arg4[%c0_24, %c0_25, %c0_26] : memref<9x16x512xf32, #tpu.memory_space<vmem>>, vector<1x16x512xf32>
    %50 = vector.shape_cast %49 : vector<1x16x512xf32> to vector<16x512xf32>
    %51 = arith.mulf %48, %50 : vector<16x512xf32>
    %c16_i32_27 = arith.constant 16 : i32
    %52 = tpu.dynamic_rotate %47 by %c16_i32_27 dim 1 : vector<16x512xf32>, i32 -> vector<16x512xf32>
    %c1_28 = arith.constant 1 : index
    %c0_29 = arith.constant 0 : index
    %c0_30 = arith.constant 0 : index
    %53 = vector.load %arg4[%c1_28, %c0_29, %c0_30] : memref<9x16x512xf32, #tpu.memory_space<vmem>>, vector<1x16x512xf32>
    %54 = vector.shape_cast %53 : vector<1x16x512xf32> to vector<16x512xf32>
    %55 = arith.mulf %52, %54 : vector<16x512xf32>
    %56 = arith.addf %51, %55 : vector<16x512xf32>
    %c15_i32_31 = arith.constant 15 : i32
    %57 = tpu.dynamic_rotate %47 by %c15_i32_31 dim 1 : vector<16x512xf32>, i32 -> vector<16x512xf32>
    %c2_32 = arith.constant 2 : index
    %c0_33 = arith.constant 0 : index
    %c0_34 = arith.constant 0 : index
    %58 = vector.load %arg4[%c2_32, %c0_33, %c0_34] : memref<9x16x512xf32, #tpu.memory_space<vmem>>, vector<1x16x512xf32>
    %59 = vector.shape_cast %58 : vector<1x16x512xf32> to vector<16x512xf32>
    %60 = arith.mulf %57, %59 : vector<16x512xf32>
    %61 = arith.addf %56, %60 : vector<16x512xf32>
    %c1_i32_35 = arith.constant 1 : i32
    %62 = tpu.dynamic_rotate %47 by %c1_i32_35 dim 1 : vector<16x512xf32>, i32 -> vector<16x512xf32>
    %c3_36 = arith.constant 3 : index
    %c0_37 = arith.constant 0 : index
    %c0_38 = arith.constant 0 : index
    %63 = vector.load %arg4[%c3_36, %c0_37, %c0_38] : memref<9x16x512xf32, #tpu.memory_space<vmem>>, vector<1x16x512xf32>
    %64 = vector.shape_cast %63 : vector<1x16x512xf32> to vector<16x512xf32>
    %65 = arith.mulf %62, %64 : vector<16x512xf32>
    %66 = arith.addf %61, %65 : vector<16x512xf32>
    %c4_39 = arith.constant 4 : index
    %c0_40 = arith.constant 0 : index
    %c0_41 = arith.constant 0 : index
    %67 = vector.load %arg4[%c4_39, %c0_40, %c0_41] : memref<9x16x512xf32, #tpu.memory_space<vmem>>, vector<1x16x512xf32>
    %68 = vector.shape_cast %67 : vector<1x16x512xf32> to vector<16x512xf32>
    %69 = arith.mulf %47, %68 : vector<16x512xf32>
    %70 = arith.addf %66, %69 : vector<16x512xf32>
    %c511_i32_42 = arith.constant 511 : i32
    %71 = tpu.dynamic_rotate %47 by %c511_i32_42 dim 1 : vector<16x512xf32>, i32 -> vector<16x512xf32>
    %c5_43 = arith.constant 5 : index
    %c0_44 = arith.constant 0 : index
    %c0_45 = arith.constant 0 : index
    %72 = vector.load %arg4[%c5_43, %c0_44, %c0_45] : memref<9x16x512xf32, #tpu.memory_space<vmem>>, vector<1x16x512xf32>
    %73 = vector.shape_cast %72 : vector<1x16x512xf32> to vector<16x512xf32>
    %74 = arith.mulf %71, %73 : vector<16x512xf32>
    %75 = arith.addf %70, %74 : vector<16x512xf32>
    %c497_i32_46 = arith.constant 497 : i32
    %76 = tpu.dynamic_rotate %47 by %c497_i32_46 dim 1 : vector<16x512xf32>, i32 -> vector<16x512xf32>
    %c6_47 = arith.constant 6 : index
    %c0_48 = arith.constant 0 : index
    %c0_49 = arith.constant 0 : index
    %77 = vector.load %arg4[%c6_47, %c0_48, %c0_49] : memref<9x16x512xf32, #tpu.memory_space<vmem>>, vector<1x16x512xf32>
    %78 = vector.shape_cast %77 : vector<1x16x512xf32> to vector<16x512xf32>
    %79 = arith.mulf %76, %78 : vector<16x512xf32>
    %80 = arith.addf %75, %79 : vector<16x512xf32>
    %c496_i32_50 = arith.constant 496 : i32
    %81 = tpu.dynamic_rotate %47 by %c496_i32_50 dim 1 : vector<16x512xf32>, i32 -> vector<16x512xf32>
    %c7_51 = arith.constant 7 : index
    %c0_52 = arith.constant 0 : index
    %c0_53 = arith.constant 0 : index
    %82 = vector.load %arg4[%c7_51, %c0_52, %c0_53] : memref<9x16x512xf32, #tpu.memory_space<vmem>>, vector<1x16x512xf32>
    %83 = vector.shape_cast %82 : vector<1x16x512xf32> to vector<16x512xf32>
    %84 = arith.mulf %81, %83 : vector<16x512xf32>
    %85 = arith.addf %80, %84 : vector<16x512xf32>
    %c495_i32_54 = arith.constant 495 : i32
    %86 = tpu.dynamic_rotate %47 by %c495_i32_54 dim 1 : vector<16x512xf32>, i32 -> vector<16x512xf32>
    %c8_55 = arith.constant 8 : index
    %c0_56 = arith.constant 0 : index
    %c0_57 = arith.constant 0 : index
    %87 = vector.load %arg4[%c8_55, %c0_56, %c0_57] : memref<9x16x512xf32, #tpu.memory_space<vmem>>, vector<1x16x512xf32>
    %88 = vector.shape_cast %87 : vector<1x16x512xf32> to vector<16x512xf32>
    %89 = arith.mulf %86, %88 : vector<16x512xf32>
    %90 = arith.addf %85, %89 : vector<16x512xf32>
    %c0_58 = arith.constant 0 : index
    %c0_59 = arith.constant 0 : index
    %91 = vector.load %arg5[%c0_58, %c0_59] : memref<32x16xf32, #tpu.memory_space<vmem>>, vector<32x16xf32>
    %cst_60 = arith.constant dense<0.000000e+00> : vector<32x512xf32>
    %92 = tpu.matmul %91, %90, %cst_60 {dimension_numbers = #tpu.dot_dimension_numbers<[1], [0], [0], [1], [0, 0, 1, 1], [], []>, precision = #tpu.contract_precision<fp32>} : vector<32x16xf32>, vector<16x512xf32>, vector<32x512xf32> -> vector<32x512xf32>
    %c0_61 = arith.constant 0 : index
    %c0_62 = arith.constant 0 : index
    %93 = vector.load %arg6[%c0_61, %c0_62] : memref<32x512xf32, #tpu.memory_space<vmem>>, vector<32x512xf32>
    tpu.vector_store %arg6[%c0_61, %c0_62], %92 {strides = array<i32>} : memref<32x512xf32, #tpu.memory_space<vmem>>, vector<32x512xf32>,
    return
  }
  func.func @transform_0(%arg0: i32) -> (i32, i32) {
    %c0_i32 = arith.constant 0 : i32
    %c0_i32_0 = arith.constant 0 : i32
    return %c0_i32, %arg0 : i32, i32
  }
  func.func @transform_1(%arg0: i32) -> (i32, i32, i32) {
    %c0_i32 = arith.constant 0 : i32
    %c0_i32_0 = arith.constant 0 : i32
    %c0_i32_1 = arith.constant 0 : i32
    %c0_i32_2 = arith.constant 0 : i32
    return %c0_i32, %c0_i32_0, %c0_i32_1 : i32, i32, i32
  }
  func.func @transform_2(%arg0: i32) -> (i32, i32) {
    %c0_i32 = arith.constant 0 : i32
    %c0_i32_0 = arith.constant 0 : i32
    %c0_i32_1 = arith.constant 0 : i32
    return %c0_i32, %c0_i32_0 : i32, i32
  }
  func.func @transform_3(%arg0: i32) -> (i32, i32, i32) {
    %c0_i32 = arith.constant 0 : i32
    %c0_i32_0 = arith.constant 0 : i32
    %c0_i32_1 = arith.constant 0 : i32
    %c0_i32_2 = arith.constant 0 : i32
    return %c0_i32, %c0_i32_0, %c0_i32_1 : i32, i32, i32
  }
  func.func @transform_4(%arg0: i32) -> (i32, i32) {
    %c0_i32 = arith.constant 0 : i32
    %c0_i32_0 = arith.constant 0 : i32
    %c0_i32_1 = arith.constant 0 : i32
    return %c0_i32, %c0_i32_0 : i32, i32
  }
  func.func @transform_5(%arg0: i32) -> (i32, i32) {
    %c0_i32 = arith.constant 0 : i32
    %c0_i32_0 = arith.constant 0 : i32
    return %c0_i32, %arg0 : i32, i32
  }
}

</mosaic_0001>

<bundles_post_ra>
// kernel: sepconv_forward.1
= control target key start
LH: loop header
LB: loop body
LE: loop exit
PB: predicated region body
PF: predicated region fallthrough
CT: control target
= control target key end

     0   :  { %s3400_s20 = smov 16   ;;  %s3401_s21 = smov 17   ;;  %v5297_v8 = vmov 0.0   ;;  %v44_v35 = vlaneseq  ;;  %vm448_vm6 = vcmask 130048   ;;  %s5291_s0 = inlined_call_operand.vmem [shape: f32[16,512], index: 0, kind: input, shape index: {}]   ;;  %s5292_s1 = inlined_call_operand.vmem [shape: f32[9,16,512], index: 1, kind: input, shape index: {}]   ;;  %s5293_s2 = inlined_call_operand.vmem [shape: f32[16,16], index: 2, kind: input, shape index: {}]   ;;  %s5294_s3 = inlined_call_operand.vmem [shape: f32[9,16,512], index: 3, kind: input, shape index: {}]   ;;  %s5295_s4 = inlined_call_operand.vmem [shape: f32[32,16], index: 4, kind: input, shape index: {}]   ;;  %s5296_s5 = inlined_call_operand.vmem [shape: f32[32,512], index: 5, kind: output, shape index: {}]  }
   0x1   :  { %v3442_v0 = vld [vmem:[%s5291_s0 + $0x20] sm:$0xff]  ;;  %v3451_v1 = vld [vmem:[%s5291_s0 + $0x28] sm:$0xff]  ;;  %v3460_v2 = vld [vmem:[%s5291_s0 + $0x38] sm:$0xff]  ;;  %s3402_s30 = smov 15   ;;  %s3403_s8 = smov 1   ;;  %523 = vmatprep.mubr.f32.mxu0 %v5297_v8  ;;  %630 = vmatprep.mubr.f32.mxu1 %v5297_v8 }
   0x2   :  { %73 = vrot.lane.b32.xlu1 %v3442_v0, %s3400_s20  ;;  %30 = vrot.lane.b32.xlu0 %v3442_v0, %s3401_s21  ;;  %v3469_v3 = vld [vmem:[%s5291_s0 + $0x8] sm:$0xff]  ;;  %v3474_v4 = vld [vmem:[%s5291_s0] sm:$0xff]  ;;  %s3404_s11 = smov 127   ;;  %s3405_s14 = smov 113   ;;  %v3659_v38 = vand.u32 127, %v44_v35 }
   0x3   :  { %v3491_v5 = vld [vmem:[%s5291_s0 + $0x18] sm:$0xff]  ;;  %v3520_v6 = vld [vmem:[%s5291_s0 + $0x30] sm:$0xff]  ;;  %s3407_s15 = smov 111   ;;  %v3268_v43 = vld [vmem:[%s5292_s1 + $0x68] sm:$0xff] }
   0x4   :  { %v3533_v7 = vld [vmem:[%s5291_s0 + $0x10] sm:$0xff]  ;;  %s3406_s0 = smov 112   ;;  %vm87_vm0 = vcmp.lt.s32.totalorder %v3659_v38, 16  ;;  %vm46_vm1 = vcmp.lt.s32.totalorder %v3659_v38, 17  ;;  %vm137_vm2 = vcmp.lt.s32.totalorder %v3659_v38, 15  ;;  %v60_v45 = vld [vmem:[%s5292_s1 + $0x28] sm:$0xff] }
   0x5   :  { %v3292_v47 = vld [vmem:[%s5292_s1 + $0x128] sm:$0xff]  ;;  %v3267_v48 = vld [vmem:[%s5292_s1 + $0x60] sm:$0xff]  ;;  %vm187_vm3 = vcmp.lt.s32.totalorder %v3659_v38, 1  ;;  %vm262_vm4 = vcmp.lt.s32.totalorder %v3659_v38, 127  ;;  %vm312_vm5 = vcmp.lt.s32.totalorder %v3659_v38, 113  ;;  %vm362_vm7 = vcmp.lt.s32.totalorder %v3659_v38, 112 }
   0x6   :  { %77 = vrot.lane.b32.xlu1 %v3451_v1, %s3400_s20  ;;  %34 = vrot.lane.b32.xlu0 %v3451_v1, %s3401_s21  ;;  %v59_v50 = vld [vmem:[%s5292_s1 + $0x20] sm:$0xff]  ;;  %v3276_v55 = vld [vmem:[%s5292_s1 + $0xa8] sm:$0xff]  ;;  %v3714_v59 = vmul.f32 %v3292_v47, %v3451_v1  ;;  %vm412_vm8 = vcmp.lt.s32.totalorder %v3659_v38, 111 }
   0x7   :  { %v3291_v52 = vld [vmem:[%s5292_s1 + $0x120] sm:$0xff]  ;;  %v3284_v62 = vld [vmem:[%s5292_s1 + $0xe8] sm:$0xff] }
   0x8   :  { %v3283_v8 = vld [vmem:[%s5292_s1 + $0xe0] sm:$0xff] }
   0xa   :  { %85 = vrot.lane.b32.xlu1 %v3460_v2, %s3400_s20  ;;  %42 = vrot.lane.b32.xlu0 %v3460_v2, %s3401_s21 }
   0xe   :  { %32 = vrot.lane.b32.xlu1 %v3469_v3, %s3401_s21  ;;  %28 = vrot.lane.b32.xlu0 %v3474_v4, %s3401_s21 }
  0x12   :  { %75 = vrot.lane.b32.xlu1 %v3469_v3, %s3400_s20  ;;  %71 = vrot.lane.b32.xlu0 %v3474_v4, %s3400_s20 }
  0x16   :  { %127 = vrot.lane.b32.xlu1 %v3451_v1, %s3402_s30  ;;  %123 = vrot.lane.b32.xlu0 %v3442_v0, %s3402_s30 }
  0x1a   :  { %83 = vrot.lane.b32.xlu1 %v3491_v5, %s3400_s20  ;;  %40 = vrot.lane.b32.xlu0 %v3491_v5, %s3401_s21 }
  0x1e   :  { %121 = vrot.lane.b32.xlu1 %v3474_v4, %s3402_s30  ;;  %135 = vrot.lane.b32.xlu0 %v3460_v2, %s3402_s30 }
  0x22   :  { %173 = vrot.lane.b32.xlu1 %v3442_v0, %s3403_s8  ;;  %125 = vrot.lane.b32.xlu0 %v3469_v3, %s3402_s30 }
  0x26   :  { %133 = vrot.lane.b32.xlu1 %v3491_v5, %s3402_s30  ;;  %177 = vrot.lane.b32.xlu0 %v3451_v1, %s3403_s8 }
  0x2a   :  { %171 = vrot.lane.b32.xlu1 %v3474_v4, %s3403_s8  ;;  %185 = vrot.lane.b32.xlu0 %v3460_v2, %s3403_s8 }
  0x2e   :  { %183 = vrot.lane.b32.xlu1 %v3491_v5, %s3403_s8  ;;  %175 = vrot.lane.b32.xlu0 %v3469_v3, %s3403_s8 }
  0x32   :  { %256 = vrot.lane.b32.xlu1 %v3520_v6, %s3404_s11  ;;  %252 = vrot.lane.b32.xlu0 %v3451_v1, %s3404_s11 }
  0x36   :  { %250 = vrot.lane.b32.xlu1 %v3469_v3, %s3404_s11  ;;  %248 = vrot.lane.b32.xlu0 %v3442_v0, %s3404_s11 }
  0x3a   :  { %302 = vrot.lane.b32.xlu1 %v3451_v1, %s3405_s14  ;;  %254 = vrot.lane.b32.xlu0 %v3533_v7, %s3404_s11 }
  0x3e   :  { %246 = vrot.lane.b32.xlu1 %v3474_v4, %s3404_s11  ;;  %306 = vrot.lane.b32.xlu0 %v3520_v6, %s3405_s14 }
  0x42   :  { %300 = vrot.lane.b32.xlu1 %v3469_v3, %s3405_s14  ;;  %298 = vrot.lane.b32.xlu0 %v3442_v0, %s3405_s14 }
  0x46   :  { %352 = vrot.lane.b32.xlu1 %v3451_v1, %s3406_s0  ;;  %304 = vrot.lane.b32.xlu0 %v3533_v7, %s3405_s14 }
  0x4a   :  { %296 = vrot.lane.b32.xlu1 %v3474_v4, %s3405_s14  ;;  %356 = vrot.lane.b32.xlu0 %v3520_v6, %s3406_s0 }
  0x4e   :  { %350 = vrot.lane.b32.xlu1 %v3469_v3, %s3406_s0  ;;  %348 = vrot.lane.b32.xlu0 %v3442_v0, %s3406_s0 }
  0x52   :  { %402 = vrot.lane.b32.xlu1 %v3451_v1, %s3407_s15  ;;  %354 = vrot.lane.b32.xlu0 %v3533_v7, %s3406_s0 }
  0x56   :  { %346 = vrot.lane.b32.xlu1 %v3474_v4, %s3406_s0  ;;  %406 = vrot.lane.b32.xlu0 %v3520_v6, %s3407_s15 }
  0x5a   :  { %400 = vrot.lane.b32.xlu1 %v3469_v3, %s3407_s15  ;;  %398 = vrot.lane.b32.xlu0 %v3442_v0, %s3407_s15 }
  0x5e   :  { %396 = vrot.lane.b32.xlu1 %v3474_v4, %s3407_s15  ;;  %404 = vrot.lane.b32.xlu0 %v3533_v7, %s3407_s15 }
  0x62   :  { %81 = vrot.lane.b32.xlu1 %v3520_v6, %s3400_s20  ;;  %38 = vrot.lane.b32.xlu0 %v3520_v6, %s3401_s21 }
  0x66   :  { %79 = vrot.lane.b32.xlu1 %v3533_v7, %s3400_s20  ;;  %36 = vrot.lane.b32.xlu0 %v3533_v7, %s3401_s21 }
  0x6a   :  { %129 = vrot.lane.b32.xlu1 %v3533_v7, %s3402_s30  ;;  %131 = vrot.lane.b32.xlu0 %v3520_v6, %s3402_s30 }
  0x6e   :  { %179 = vrot.lane.b32.xlu1 %v3533_v7, %s3403_s8  ;;  %181 = vrot.lane.b32.xlu0 %v3520_v6, %s3403_s8 }
  0x72   :  { %258 = vrot.lane.b32.xlu1 %v3491_v5, %s3404_s11  ;;  %260 = vrot.lane.b32.xlu0 %v3460_v2, %s3404_s11 }
  0x74   :  { %v74_v9 = vpop.permute.xlu1 %73  ;;  %v31_v10 = vpop.permute.xlu0 %30 }
  0x76   :  { %308 = vrot.lane.b32.xlu1 %v3491_v5, %s3405_s14  ;;  %310 = vrot.lane.b32.xlu0 %v3460_v2, %s3405_s14 }
  0x78   :  { %v3601_v11 = vpop.permute.xlu1 %77  ;;  %v3603_v12 = vpop.permute.xlu0 %34 }
  0x79   :  { %v93_v44 = vsel %vm87_vm0, %v74_v9, %v3601_v11  ;;  %v52_v46 = vsel %vm46_vm1, %v31_v10, %v3603_v12 }
  0x7a   :  { %358 = vrot.lane.b32.xlu1 %v3491_v5, %s3406_s0  ;;  %360 = vrot.lane.b32.xlu0 %v3460_v2, %s3406_s0  ;;  %v110_v57 = vmul.f32 %v3268_v43, %v93_v44  ;;  %v68_v58 = vmul.f32 %v60_v45, %v52_v46  ;;  %v3275_v43 = vld [vmem:[%s5292_s1 + $0xa0] sm:$0xff]  ;;  %v56_v46 = vld [vmem:[%s5292_s1 + $0x8] sm:$0xff] }
  0x7c   :  { %v3609_v13 = vpop.permute.xlu1 %85  ;;  %v3611_v14 = vpop.permute.xlu0 %42 }
  0x7d   :  { %v95_v49 = vsel %vm87_vm0, %v3609_v13, %v74_v9  ;;  %v54_v51 = vsel %vm46_vm1, %v3611_v14, %v31_v10  ;;  %v3724_v9 = vmul.f32 %v3291_v52, %v3442_v0  ;;  %v3264_v10 = vld [vmem:[%s5292_s1 + $0x48] sm:$0xff] }
  0x7e   :  { %408 = vrot.lane.b32.xlu1 %v3491_v5, %s3407_s15  ;;  %410 = vrot.lane.b32.xlu0 %v3460_v2, %s3407_s15  ;;  %v109_v60 = vmul.f32 %v3267_v48, %v95_v49  ;;  %v67_v61 = vmul.f32 %v59_v50, %v54_v51  ;;  %v3263_v48 = vld [vmem:[%s5292_s1 + $0x40] sm:$0xff]  ;;  %v118_v49 = vadd.f32 %v110_v57, %v68_v58  ;;  %v3272_v52 = vld [vmem:[%s5292_s1 + $0x88] sm:$0xff] }
  0x7f   :  { %v55_v50 = vld [vmem:[%s5292_s1] sm:$0xff] }
  0x80   :  { %v3617_v15 = vpop.permute.xlu1 %32  ;;  %v3619_v16 = vpop.permute.xlu0 %28 }
  0x81   :  { %v51_v47 = vsel %vm46_vm1, %v3619_v16, %v3617_v15 }
  0x84   :  { %v3621_v17 = vpop.permute.xlu1 %75  ;;  %v3623_v18 = vpop.permute.xlu0 %71 }
  0x85   :  { %v92_v1 = vsel %vm87_vm0, %v3623_v18, %v3621_v17 }
  0x86   :  { %v106_v57 = vmul.f32 %v3264_v10, %v92_v1  ;;  %v3280_v10 = vld [vmem:[%s5292_s1 + $0xc8] sm:$0xff] }
  0x88   :  { %v3625_v19 = vpop.permute.xlu1 %127  ;;  %v124_v20 = vpop.permute.xlu0 %123 }
  0x89   :  { %5322 = vst [vmem:[#allocation2_spill] sm:$0xff] %v3625_v19  ;;  %v143_v56 = vsel %vm137_vm2, %v124_v20, %v3625_v19  ;;  %v3279_v19 = vld [vmem:[%s5292_s1 + $0xc0] sm:$0xff] }
  0x8a   :  { %v160_v35 = vmul.f32 %v3276_v55, %v143_v56  ;;  %v117_v56 = vadd.f32 %v109_v60, %v67_v61  ;;  %v64_v60 = vmul.f32 %v56_v46, %v51_v47  ;;  %v3300_v47 = vld [vmem:[%s5292_s1 + $0x168] sm:$0xff] }
  0x8c   :  { %v3627_v21 = vpop.permute.xlu1 %83  ;;  %v3629_v22 = vpop.permute.xlu0 %40  ;;  %v168_v61 = vadd.f32 %v160_v35, %v118_v49  ;;  %v3271_v35 = vld [vmem:[%s5292_s1 + $0x80] sm:$0xff] }
  0x8d   :  { %v53_v51 = vsel %vm46_vm1, %v3629_v22, %v3619_v16 }
  0x90   :  { %v3631_v23 = vpop.permute.xlu1 %121  ;;  %v3633_v24 = vpop.permute.xlu0 %135 }
  0x91   :  { %v145_v44 = vsel %vm137_vm2, %v3633_v24, %v124_v20  ;;  %v94_v20 = vsel %vm87_vm0, %v3627_v21, %v3623_v18 }
  0x92   :  { %v159_v58 = vmul.f32 %v3275_v43, %v145_v44  ;;  %v63_v44 = vmul.f32 %v55_v50, %v53_v51 }
  0x94   :  { %v3635_v25 = vpop.permute.xlu1 %173  ;;  %v3637_v26 = vpop.permute.xlu0 %125 }
  0x95   :  { %v142_v18 = vsel %vm137_vm2, %v3631_v23, %v3637_v26 }
  0x98   :  { %v3639_v27 = vpop.permute.xlu1 %133  ;;  %v3641_v28 = vpop.permute.xlu0 %177 }
  0x99   :  { %5323 = vst [vmem:[#allocation3_spill] sm:$0xff] %v3641_v28  ;;  %v193_v63 = vsel %vm187_vm3, %v3635_v25, %v3641_v28  ;;  %v446_v28 = vld [vmem:[%s5293_s2] sm:$0xff]  ;;  %v144_v46 = vsel %vm137_vm2, %v3639_v27, %v3631_v23 }
  0x9a   :  { %v210_v55 = vmul.f32 %v3284_v62, %v193_v63  ;;  %v447_v62 = vld [vmem:[%s5293_s2 + $0x8] sm:$0xff]  ;;  %v105_v63 = vmul.f32 %v3263_v48, %v94_v20  ;;  %v450_v50 = vsel %vm448_vm6, %v446_v28, 0  ;;  %v155_v23 = vmul.f32 %v3271_v35, %v144_v46  ;;  %v3299_v46 = vld [vmem:[%s5292_s1 + $0x160] sm:$0xff] }
  0x9b   :  { %v453_v51 = vsel %vm448_vm6, %v447_v62, 0  ;;  %v3288_v28 = vld [vmem:[%s5292_s1 + $0x108] sm:$0xff] }
  0x9c   :  { %v3643_v29 = vpop.permute.xlu1 %171  ;;  %v3645_v30 = vpop.permute.xlu0 %185  ;;  %v218_v20 = vadd.f32 %v210_v55, %v168_v61  ;;  %v113_v62 = vadd.f32 %v105_v63, %v63_v44  ;;  %v3836_v61 = vand.u32 4294901760, %v450_v50  ;;  %v3316_v63 = vld [vmem:[%s5292_s1 + $0x1e8] sm:$0xff] }
  0x9d   :  { %5324 = vst [vmem:[#allocation4_spill] sm:$0xff] %v3645_v30  ;;  %v195_v16 = vsel %vm187_vm3, %v3645_v30, %v3635_v25  ;;  %v156_v30 = vmul.f32 %v3272_v52, %v142_v18  ;;  %v114_v52 = vadd.f32 %v106_v57, %v64_v60  ;;  %v167_v18 = vadd.f32 %v159_v58, %v117_v56  ;;  %v3308_v56 = vld [vmem:[%s5292_s1 + $0x1a8] sm:$0xff] }
  0x9e   :  { %v209_v49 = vmul.f32 %v3283_v8, %v195_v16  ;;  %v243_v35 = vadd.f32 %v3714_v59, %v218_v20 }
  0x9f   :  { %v164_v60 = vadd.f32 %v156_v30, %v114_v52 }
  0xa0   :  { %v3647_v31 = vpop.permute.xlu1 %183  ;;  %v3649_v32 = vpop.permute.xlu0 %175 }
  0xa1   :  { %5325 = vst [vmem:[#allocation5_spill] sm:$0xff] %v3649_v32  ;;  %v192_v25 = vsel %vm187_vm3, %v3643_v29, %v3649_v32  ;;  %v194_v55 = vsel %vm187_vm3, %v3647_v31, %v3643_v29  ;;  %v3287_v29 = vld [vmem:[%s5292_s1 + $0x100] sm:$0xff] }
  0xa2   :  { %v206_v32 = vmul.f32 %v3280_v10, %v192_v25  ;;  %v3838_v10 = vand.u32 4294901760, %v453_v51  ;;  %v217_v25 = vadd.f32 %v209_v49, %v167_v18  ;;  %v163_v49 = vadd.f32 %v155_v23, %v113_v62 }
  0xa3   :  { %v230_v18 = vmul.f32 %v3287_v29, %v3474_v4 }
  0xa4   :  { %v3651_v33 = vpop.permute.xlu1 %256  ;;  %v3653_v34 = vpop.permute.xlu0 %252  ;;  %v214_v59 = vadd.f32 %v206_v32, %v164_v60  ;;  %v242_v23 = vadd.f32 %v3724_v9, %v217_v25  ;;  %v3315_v9 = vld [vmem:[%s5292_s1 + $0x1e0] sm:$0xff] }
  0xa5   :  { %5326 = vst [vmem:[#allocation6_spill] sm:$0xff] %v3651_v33  ;;  %v266_v48 = vsel %vm262_vm4, %v3653_v34, %v3651_v33  ;;  %v3296_v33 = vld [vmem:[%s5292_s1 + $0x148] sm:$0xff] }
  0xa6   :  { %v285_v8 = vmul.f32 %v3300_v47, %v266_v48  ;;  %v205_v47 = vmul.f32 %v3279_v19, %v194_v55  ;;  %v231_v48 = vmul.f32 %v3288_v28, %v3469_v3  ;;  %v3307_v19 = vld [vmem:[%s5292_s1 + $0x1a0] sm:$0xff]  ;;  %v3883_v28 = vsub.f32 %v450_v50, %v3836_v61 }
  0xa7   :  { %v3295_v55 = vld [vmem:[%s5292_s1 + $0x140] sm:$0xff] }
  0xa8   :  { %v3655_v36 = vpop.permute.xlu1 %250  ;;  %v3657_v37 = vpop.permute.xlu0 %248  ;;  %v293_v52 = vadd.f32 %v285_v8, %v243_v35  ;;  %v3303_v35 = vld [vmem:[%s5292_s1 + $0x180] sm:$0xff] }
  0xa9   :  { %5327 = vst [vmem:[#allocation7_spill] sm:$0xff] %v3657_v37  ;;  %v268_v30 = vsel %vm262_vm4, %v3657_v37, %v3653_v34 }
  0xaa   :  { %v284_v37 = vmul.f32 %v3299_v46, %v268_v30 }
  0xac   :  { %v3661_v39 = vpop.permute.xlu1 %302  ;;  %v3663_v40 = vpop.permute.xlu0 %254  ;;  %v292_v30 = vadd.f32 %v284_v37, %v242_v23 }
  0xad   :  { %v265_v3 = vsel %vm262_vm4, %v3655_v36, %v3663_v40 }
  0xae   :  { %v281_v50 = vmul.f32 %v3296_v33, %v265_v3 }
  0xb0   :  { %v3667_v41 = vpop.permute.xlu1 %246  ;;  %v3669_v42 = vpop.permute.xlu0 %306 }
  0xb1   :  { %5328 = vst [vmem:[#allocation8_spill] sm:$0xff] %v3669_v42  ;;  %v316_v57 = vsel %vm312_vm5, %v3661_v39, %v3669_v42  ;;  %v267_v8 = vsel %vm262_vm4, %v3667_v41, %v3655_v36  ;;  %v3324_v36 = vld [vmem:[%s5292_s1 + $0x228] sm:$0xff] }
  0xb2   :  { %v335_v20 = vmul.f32 %v3308_v56, %v316_v57  ;;  %v3886_v56 = vsub.f32 %v453_v51, %v3838_v10  ;;  %v213_v57 = vadd.f32 %v205_v47, %v163_v49  ;;  %v3304_v51 = vld [vmem:[%s5292_s1 + $0x188] sm:$0xff] }
  0xb4   :  { %v3703_v53 = vpop.permute.xlu1 %300  ;;  %v3705_v54 = vpop.permute.xlu0 %298  ;;  %v343_v62 = vadd.f32 %v335_v20, %v293_v52  ;;  %v3311_v20 = vld [vmem:[%s5292_s1 + $0x1c0] sm:$0xff]  ;;  %v238_v52 = vadd.f32 %v230_v18, %v213_v57 }
  0xb5   :  { %v318_v4 = vsel %vm312_vm5, %v3705_v54, %v3661_v39  ;;  %v239_v39 = vadd.f32 %v231_v48, %v214_v59  ;;  %v3312_v48 = vld [vmem:[%s5292_s1 + $0x1c8] sm:$0xff] }
  0xb6   :  { %v334_v29 = vmul.f32 %v3307_v19, %v318_v4  ;;  %v3323_v4 = vld [vmem:[%s5292_s1 + $0x220] sm:$0xff] }
  0xb7   :  { %v289_v23 = vadd.f32 %v281_v50, %v239_v39 }
  0xb8   :  { %v3740_v0 = vpop.permute.xlu1 %352  ;;  %v3742_v45 = vpop.permute.xlu0 %304 }
  0xb9   :  { %v315_v25 = vsel %vm312_vm5, %v3703_v53, %v3742_v45 }
  0xba   :  { %v331_v3 = vmul.f32 %v3304_v51, %v315_v25 }
  0xbc   :  { %v3793_v1 = vpop.permute.xlu1 %296  ;;  %v3795_v43 = vpop.permute.xlu0 %356  ;;  %v339_v39 = vadd.f32 %v331_v3, %v289_v23  ;;  %v3290_v23 = vld [vmem:[%s5292_s1 + $0x118] sm:$0xff] }
  0xbd   :  { %v366_v44 = vsel %vm362_vm7, %v3740_v0, %v3795_v43 }
  0xbe   :  { %v385_v32 = vmul.f32 %v3316_v63, %v366_v44  ;;  %v280_v63 = vmul.f32 %v3295_v55, %v267_v8  ;;  %v342_v55 = vadd.f32 %v334_v29, %v292_v30  ;;  %v3319_v29 = vld [vmem:[%s5292_s1 + $0x200] sm:$0xff] }
  0xc0   :  { %v351_v58 = vpop.permute.xlu1 %350  ;;  %v3831_v16 = vpop.permute.xlu0 %348  ;;  %v393_v44 = vadd.f32 %v385_v32, %v343_v62  ;;  %v3935_v32 = vand.u32 4294901760, %v3883_v28 }
  0xc1   :  { %v368_v60 = vsel %vm362_vm7, %v3831_v16, %v3740_v0  ;;  %v317_v0 = vsel %vm312_vm5, %v3793_v1, %v3703_v53 }
  0xc2   :  { %v384_v59 = vmul.f32 %v3315_v9, %v368_v60  ;;  %v330_v19 = vmul.f32 %v3303_v35, %v317_v0  ;;  %v3940_v60 = vand.u32 4294901760, %v3886_v56  ;;  %v3320_v0 = vld [vmem:[%s5292_s1 + $0x208] sm:$0xff] }
  0xc4   :  { %v403_v42 = vpop.permute.xlu1 %402  ;;  %v3857_v34 = vpop.permute.xlu0 %354  ;;  %v392_v51 = vadd.f32 %v384_v59, %v342_v55  ;;  %v538_v59 = vsub.f32 %v3886_v56, %v3940_v60 }
  0xc5   :  { %v365_v53 = vsel %vm362_vm7, %v351_v58, %v3857_v34 }
  0xc6   :  { %v381_v18 = vmul.f32 %v3312_v48, %v365_v53 }
  0xc8   :  { %v3912_v33 = vpop.permute.xlu1 %346  ;;  %v3914_v46 = vpop.permute.xlu0 %406  ;;  %v389_v48 = vadd.f32 %v381_v18, %v339_v39 }
  0xc9   :  { %v416_v47 = vsel %vm412_vm8, %v403_v42, %v3914_v46  ;;  %v367_v37 = vsel %vm362_vm7, %v3912_v33, %v351_v58  ;;  %v288_v58 = vadd.f32 %v280_v63, %v238_v52 }
  0xca   :  { %v435_v49 = vmul.f32 %v3324_v36, %v416_v47  ;;  %v380_v57 = vmul.f32 %v3311_v20, %v367_v37  ;;  %v527_v47 = vsub.f32 %v3883_v28, %v3935_v32 }
  0xcb   :  { %v338_v50 = vadd.f32 %v330_v19, %v288_v58 }
  0xcc   :  { %v443_v8 = vadd.f32 %v435_v49, %v393_v44  ;;  %v401_v62 = vpop.permute.xlu1 %400  ;;  %v3937_v9 = vpop.permute.xlu0 %398 }
  0xcd   :  { %v418_v36 = vsel %vm412_vm8, %v3937_v9, %v403_v42  ;;  %v388_v53 = vadd.f32 %v380_v57, %v338_v50  ;;  %v61_v50 = vld [vmem:[%s5292_s1 + $0x30] sm:$0xff] }
  0xce   :  { %v3945_v25 = vand.u32 4294901760, %v443_v8  ;;  %v434_v35 = vmul.f32 %v3323_v4, %v418_v36  ;;  %v3289_v4 = vld [vmem:[%s5292_s1 + $0x110] sm:$0xff] }
  0xcf   :  { %v3293_v36 = vld [vmem:[%s5292_s1 + $0x130] sm:$0xff] }
  0xd0   :  { %v442_v30 = vadd.f32 %v434_v35, %v392_v51  ;;  %v3953_v63 = vpop.permute.xlu1 %396  ;;  %484 = vmatprep.subr.mxu0 %v3945_v25  ;;  %v3956_v42 = vpop.permute.xlu0 %404  ;;  %v3959_v44 = vsub.f32 %v443_v8, %v3945_v25  ;;  %v3294_v51 = vld [vmem:[%s5292_s1 + $0x138] sm:$0xff]  ;;  %v3269_v35 = vld [vmem:[%s5292_s1 + $0x70] sm:$0xff] }
  0xd1   :  { %v417_v20 = vsel %vm412_vm8, %v3953_v63, %v401_v62  ;;  %v415_v37 = vsel %vm412_vm8, %v401_v62, %v3956_v42 }
  0xd2   :  { %v3971_v49 = vand.u32 4294901760, %v442_v30  ;;  %v430_v52 = vmul.f32 %v3319_v29, %v417_v20  ;;  %v431_v3 = vmul.f32 %v3320_v0, %v415_v37  ;;  %v5306_v19 = vand.u32 4294901760, %v3959_v44  ;;  %v3265_v37 = vld [vmem:[%s5292_s1 + $0x50] sm:$0xff] }
  0xd3   :  { %v4005_v0 = vand.u32 4294901760, %v527_v47  ;;  %v4014_v20 = vmul.f32 %v3289_v4, %v3533_v7  ;;  %v4030_v7 = vmul.f32 %v3294_v51, %v3460_v2 }
  0xd4   :  { %v3981_v55 = vsub.f32 %v442_v30, %v3971_v49  ;;  %v438_v8 = vadd.f32 %v430_v52, %v388_v53  ;;  %v439_v58 = vadd.f32 %v431_v3, %v389_v48  ;;  %v82_v62 = vpop.permute.xlu1 %81  ;;  %486 = vmatpush1.msra.mxu0 %v3971_v49  ;;  %v39_v18 = vpop.permute.xlu0 %38  ;;  %v577_v57 = vsub.f32 %v3959_v44, %v5306_v19 }
  0xd5   :  { %v91_v39 = vsel %vm87_vm0, %v3601_v11, %v82_v62  ;;  %v50_v29 = vsel %vm46_vm1, %v3603_v12, %v39_v18  ;;  %v4007_v30 = vand.u32 4294901760, %v538_v59  ;;  %v4017_v11 = vmul.f32 %v3290_v23, %v3491_v5  ;;  %v3266_v12 = vld [vmem:[%s5292_s1 + $0x58] sm:$0xff] }
  0xd6   :  { %v4009_v48 = vand.u32 4294901760, %v438_v8  ;;  %v4011_v53 = vand.u32 4294901760, %v439_v58  ;;  %v578_v47 = vand.u32 4294901760, %v577_v57  ;;  %v582_v59 = vand.u32 4294901760, %v3981_v55  ;;  %v57_v57 = vld [vmem:[%s5292_s1 + $0x10] sm:$0xff] }
  0xd7   :  { %v4027_v52 = vmul.f32 %v3293_v36, %v3520_v6  ;;  %v111_v3 = vmul.f32 %v3269_v35, %v91_v39  ;;  %v69_v4 = vmul.f32 %v61_v50, %v50_v29  ;;  %v58_v6 = vld [vmem:[%s5292_s1 + $0x18] sm:$0xff]  ;;  %v89_v51 = vsel %vm87_vm0, %v82_v62, %v3609_v13 }
  0xd8   :  { %v4033_v5 = vsub.f32 %v438_v8, %v4009_v48  ;;  %v80_v23 = vpop.permute.xlu1 %79  ;;  %488 = vmatprep.subr.mxu0 %v4011_v53  ;;  %v37_v36 = vpop.permute.xlu0 %36  ;;  %v4043_v2 = vsub.f32 %v439_v58, %v4011_v53  ;;  %v3270_v8 = vld [vmem:[%s5292_s1 + $0x78] sm:$0xff]  ;;  %v48_v39 = vsel %vm46_vm1, %v39_v18, %v3611_v14  ;;  %579 = vmatprep.subr.mxu1 %v578_v47 }
  0xd9   :  { %v62_v35 = vld [vmem:[%s5292_s1 + $0x38] sm:$0xff]  ;;  %v88_v58 = vsel %vm87_vm0, %v80_v23, %v3627_v21  ;;  %v90_v50 = vsel %vm87_vm0, %v3621_v17, %v80_v23  ;;  %v47_v13 = vsel %vm46_vm1, %v37_v36, %v3629_v22  ;;  %v49_v62 = vsel %vm46_vm1, %v3617_v15, %v37_v36  ;;  %490 = vmatpush1.msra.mxu0 %v4009_v48  ;;  %v3273_v17 = vld [vmem:[%s5292_s1 + $0x90] sm:$0xff] }
  0xda   :  { %v107_v29 = vmul.f32 %v3265_v37, %v90_v50  ;;  %v108_v19 = vmul.f32 %v3266_v12, %v88_v58  ;;  %v65_v14 = vmul.f32 %v57_v57, %v49_v62  ;;  %v66_v18 = vmul.f32 %v58_v6, %v47_v13  ;;  %529 = vmatmul.mubr.f32.vlgmr.msra.gmra.mxu0 %v4005_v0  ;;  %v3274_v21 = vld [vmem:[%s5292_s1 + $0x98] sm:$0xff] }
  0xdb   :  { %675 = vmatprep.subr.mxu0 %v3959_v44  ;;  %v583_v15 = vsub.f32 %v3981_v55, %v582_v59  ;;  %v588_v22 = vand.u32 4294901760, %v4043_v2  ;;  %v112_v37 = vmul.f32 %v3270_v8, %v89_v51  ;;  %v70_v12 = vmul.f32 %v62_v35, %v48_v39  ;;  %v3278_v57 = vld [vmem:[%s5292_s1 + $0xb8] sm:$0xff] }
  0xdc   :  { %v119_v47 = vadd.f32 %v111_v3, %v69_v4  ;;  %678 = vmatpush1.msra.mxu0 %v3981_v55  ;;  %v130_v23 = vpop.permute.xlu1 %129  ;;  %v132_v6 = vpop.permute.xlu0 %131  ;;  %v5329_v36 = vmov 0.0   ;;  %v594_v58 = vand.u32 4294901760, %v4033_v5  ;;  %v115_v50 = vadd.f32 %v107_v29, %v65_v14  ;;  %v3277_v4 = vld [vmem:[%s5292_s1 + $0xb0] sm:$0xff] }
  0xdd   :  { %534 = vmatprep.mubr.f32.mxu0 %v5329_v36  ;;  %v116_v13 = vadd.f32 %v108_v19, %v66_v18  ;;  %v138_v8 = vsel %vm137_vm2, %v130_v23, %v3639_v27  ;;  %v140_v3 = vsel %vm137_vm2, %v3637_v26, %v130_v23  ;;  %681 = vmatprep.subr.mxu0 %v4043_v2  ;;  %v584_v39 = vand.u32 4294901760, %v583_v15  ;;  %v5330_v27 = vld [vmem:[#allocation2_spill] sm:$0xff]  ;;  %v3281_v14 = vld [vmem:[%s5292_s1 + $0xd0] sm:$0xff] }
  0xde   :  { %v157_v51 = vmul.f32 %v3273_v17, %v140_v3  ;;  %v158_v35 = vmul.f32 %v3274_v21, %v138_v8  ;;  %v139_v19 = vsel %vm137_vm2, %v132_v6, %v3633_v24  ;;  %684 = vmatpush1.msra.mxu0 %v4033_v5  ;;  %v141_v29 = vsel %vm137_vm2, %v5330_v27, %v132_v6  ;;  %v3282_v24 = vld [vmem:[%s5292_s1 + $0xd8] sm:$0xff] }
  0xdf   :  { %v162_v26 = vmul.f32 %v3278_v57, %v139_v19  ;;  %540 = vmatmul.mubr.f32.gmra.mxu0 %v4007_v30  ;;  %v5331_v62 = vand.u32 4294901760, %v3959_v44  ;;  %v589_v18 = vsub.f32 %v4043_v2, %v588_v22  ;;  %v120_v17 = vadd.f32 %v112_v37, %v70_v12  ;;  %585 = vmatpush1.msra.mxu1 %v584_v39  ;;  %v3286_v44 = vld [vmem:[%s5292_s1 + $0xf8] sm:$0xff]  ;;  %v5333_v19 = vld [vmem:[#allocation4_spill] sm:$0xff] }
  0xe0   :  { %v165_v21 = vadd.f32 %v157_v51, %v115_v50  ;;  %v161_v15 = vmul.f32 %v3277_v4, %v141_v29  ;;  %v180_v23 = vpop.permute.xlu1 %179  ;;  %v182_v57 = vpop.permute.xlu0 %181  ;;  %v595_v6 = vsub.f32 %v4033_v5, %v594_v58  ;;  %v166_v8 = vadd.f32 %v158_v35, %v116_v13  ;;  %v5332_v2 = vld [vmem:[#allocation5_spill] sm:$0xff]  ;;  %v3285_v50 = vld [vmem:[%s5292_s1 + $0xf0] sm:$0xff]  ;;  %717 = vmatprep.mubr.f32.mxu0 %v5329_v36 }
  0xe1   :  { %852 = vmatprep.subr.mxu0 %v5331_v62  ;;  %v188_v3 = vsel %vm187_vm3, %v180_v23, %v3647_v31  ;;  %v190_v37 = vsel %vm187_vm3, %v5332_v2, %v180_v23  ;;  %v590_v12 = vand.u32 4294901760, %v589_v18  ;;  %v170_v4 = vadd.f32 %v162_v26, %v120_v17  ;;  %v5334_v31 = vld [vmem:[#allocation3_spill] sm:$0xff]  ;;  %v3297_v26 = vld [vmem:[%s5292_s1 + $0x150] sm:$0xff]  ;;  %v3298_v17 = vld [vmem:[%s5292_s1 + $0x158] sm:$0xff] }
  0xe2   :  { %v207_v51 = vmul.f32 %v3281_v14, %v190_v37  ;;  %v208_v39 = vmul.f32 %v3282_v24, %v188_v3  ;;  %v189_v13 = vsel %vm187_vm3, %v182_v57, %v5333_v19  ;;  %v169_v35 = vadd.f32 %v161_v15, %v119_v47  ;;  %v5336_v3 = vld [vmem:[#allocation7_spill] sm:$0xff]  ;;  %v3306_v5 = vld [vmem:[%s5292_s1 + $0x198] sm:$0xff] }
  0xe3   :  { %591 = vmatprep.subr.mxu1 %v590_v12  ;;  %v191_v27 = vsel %vm187_vm3, %v5334_v31, %v182_v57  ;;  %v212_v29 = vmul.f32 %v3286_v44, %v189_v13  ;;  %v596_v62 = vand.u32 4294901760, %v595_v6  ;;  %720 = vmatmul.mubr.f32.vlgmr.msra.gmra.mxu0 %v3883_v28  ;;  %v5335_v57 = vld [vmem:[#allocation6_spill] sm:$0xff]  ;;  %v3310_v19 = vld [vmem:[%s5292_s1 + $0x1b8] sm:$0xff]  ;;  %v5337_v31 = vld [vmem:[#allocation8_spill] sm:$0xff] }
  0xe4   :  { %v215_v18 = vadd.f32 %v207_v51, %v165_v21  ;;  %v216_v23 = vadd.f32 %v208_v39, %v166_v8  ;;  %v211_v2 = vmul.f32 %v3285_v50, %v191_v27  ;;  %856 = vmatpush1.msra.mxu0 %v582_v59  ;;  %v259_v47 = vpop.permute.xlu1 %258  ;;  %v261_v14 = vpop.permute.xlu0 %260  ;;  %725 = vmatprep.mubr.f32.mxu0 %v5329_v36 }
  0xe5   :  { %v220_v24 = vadd.f32 %v212_v29, %v170_v4  ;;  %597 = vmatpush1.msra.mxu1 %v596_v62  ;;  %860 = vmatprep.subr.mxu0 %v588_v22  ;;  %v263_v55 = vsel %vm262_vm4, %v3663_v40, %v259_v47  ;;  %v269_v59 = vsel %vm262_vm4, %v259_v47, %v3667_v41  ;;  %v3301_v22 = vld [vmem:[%s5292_s1 + $0x170] sm:$0xff]  ;;  %v3302_v40 = vld [vmem:[%s5292_s1 + $0x178] sm:$0xff] }
  0xe6   :  { %v219_v21 = vadd.f32 %v211_v2, %v169_v35  ;;  %632 = vmatmul.mubr.f32.vlgmr.msra.gmra.mxu1 %v3836_v61  ;;  %763 = vmatprep.subr.mxu1 %v3945_v25  ;;  %v240_v15 = vadd.f32 %v4014_v20, %v215_v18  ;;  %v282_v44 = vmul.f32 %v3297_v26, %v263_v55  ;;  %v3305_v20 = vld [vmem:[%s5292_s1 + $0x190] sm:$0xff]  ;;  %v3314_v62 = vld [vmem:[%s5292_s1 + $0x1d8] sm:$0xff] }
  0xe7   :  { %765 = vmatpush1.msra.mxu1 %v3971_v49  ;;  %v264_v41 = vsel %vm262_vm4, %v5335_v57, %v261_v14  ;;  %v241_v6 = vadd.f32 %v4017_v11, %v216_v23  ;;  %v283_v8 = vmul.f32 %v3298_v17, %v269_v59  ;;  %v270_v37 = vsel %vm262_vm4, %v261_v14, %v5336_v3  ;;  %v3317_v23 = vld [vmem:[%s5292_s1 + $0x1f0] sm:$0xff] }
  0xe8   :  { %767 = vmatprep.subr.mxu1 %v4011_v53  ;;  %864 = vmatpush1.msra.mxu0 %v594_v58  ;;  %v309_v12 = vpop.permute.xlu1 %308  ;;  %v311_v50 = vpop.permute.xlu0 %310  ;;  %v244_v4 = vadd.f32 %v4027_v52, %v219_v21  ;;  %v245_v11 = vadd.f32 %v4030_v7, %v220_v24  ;;  %v286_v51 = vmul.f32 %v3301_v22, %v264_v41  ;;  %v3309_v58 = vld [vmem:[%s5292_s1 + $0x1b0] sm:$0xff]  ;;  %v3318_v24 = vld [vmem:[%s5292_s1 + $0x1f8] sm:$0xff] }
  0xe9   :  { %637 = vmatprep.mubr.f32.mxu1 %v5329_v36  ;;  %769 = vmatpush1.msra.mxu1 %v4009_v48  ;;  %v287_v39 = vmul.f32 %v3302_v40, %v270_v37  ;;  %v313_v52 = vsel %vm312_vm5, %v3742_v45, %v309_v12  ;;  %v319_v7 = vsel %vm312_vm5, %v309_v12, %v3793_v1  ;;  %v3313_v45 = vld [vmem:[%s5292_s1 + $0x1d0] sm:$0xff]  ;;  %v3326_v37 = vld [vmem:[%s5292_s1 + $0x238] sm:$0xff] }
  0xea   :  { %639 = vmatmul.mubr.f32.gmra.mxu1 %v3838_v10  ;;  %941 = vmatprep.subr.mxu1 %v3945_v25  ;;  %v290_v13 = vadd.f32 %v282_v44, %v240_v15  ;;  %v332_v35 = vmul.f32 %v3305_v20, %v313_v52  ;;  %v314_v27 = vsel %vm312_vm5, %v5337_v31, %v311_v50  ;;  %v3321_v40 = vld [vmem:[%s5292_s1 + $0x210] sm:$0xff] }
  0xeb   :  { %728 = vmatmul.mubr.f32.gmra.mxu0 %v3886_v56  ;;  %v333_v25 = vmul.f32 %v3306_v5, %v319_v7  ;;  %v320_v1 = vsel %vm312_vm5, %v311_v50, %v3705_v54  ;;  %v336_v29 = vmul.f32 %v3309_v58, %v314_v27  ;;  %802 = vmatprep.mubr.f32.mxu1 %v5329_v36 }
  0xec   :  { %897 = vmatprep.mubr.f32.mxu0 %v5329_v36  ;;  %v359_v18 = vpop.permute.xlu1 %358  ;;  %v361_v2 = vpop.permute.xlu0 %360  ;;  %v291_v26 = vadd.f32 %v283_v8, %v241_v6  ;;  %v294_v47 = vadd.f32 %v286_v51, %v244_v4  ;;  %v337_v14 = vmul.f32 %v3310_v19, %v320_v1  ;;  %v295_v17 = vadd.f32 %v287_v39, %v245_v11 }
  0xed   :  { %v363_v54 = vsel %vm362_vm7, %v3857_v34, %v359_v18  ;;  %v369_v55 = vsel %vm362_vm7, %v359_v18, %v3912_v33  ;;  %v364_v21 = vsel %vm362_vm7, %v3795_v43, %v361_v2  ;;  %v340_v22 = vadd.f32 %v332_v35, %v290_v13  ;;  %v3322_v43 = vld [vmem:[%s5292_s1 + $0x218] sm:$0xff] }
  0xee   :  { %806 = vmatmul.mubr.f32.vlgmr.msra.gmra.mxu1 %v3935_v32  ;;  %v382_v59 = vmul.f32 %v3313_v45, %v363_v54  ;;  %v383_v34 = vmul.f32 %v3314_v62, %v369_v55  ;;  %v370_v15 = vsel %vm362_vm7, %v361_v2, %v3831_v16  ;;  %v386_v44 = vmul.f32 %v3317_v23, %v364_v21 }
  0xef   :  { %943 = vmatpush1.msra.mxu1 %v3971_v49  ;;  %v341_v57 = vadd.f32 %v333_v25, %v291_v26  ;;  %v344_v33 = vadd.f32 %v336_v29, %v294_v47  ;;  %v387_v41 = vmul.f32 %v3318_v24, %v370_v15  ;;  %899 = vmatmul.mubr.f32.vlgmr.msra.gmra.mxu0 %v3836_v61 }
  0xf0   :  { %945 = vmatprep.subr.mxu1 %v4011_v53  ;;  %v409_v49 = vpop.permute.xlu1 %408  ;;  %v411_v6 = vpop.permute.xlu0 %410  ;;  %v345_v8 = vadd.f32 %v337_v14, %v295_v17  ;;  %v390_v16 = vadd.f32 %v382_v59, %v340_v22  ;;  %811 = vmatprep.mubr.f32.mxu1 %v5329_v36  ;;  %v3325_v53 = vld [vmem:[%s5292_s1 + $0x230] sm:$0xff] }
  0xf1   :  { %947 = vmatpush1.msra.mxu1 %v4009_v48  ;;  %v413_v3 = vsel %vm412_vm8, %v3956_v42, %v409_v49  ;;  %v391_v20 = vadd.f32 %v383_v34, %v341_v57  ;;  %904 = vmatprep.mubr.f32.mxu0 %v5329_v36  ;;  %v419_v48 = vsel %vm412_vm8, %v409_v49, %v3953_v63 }
  0xf2   :  { %815 = vmatmul.mubr.f32.gmra.mxu1 %v3940_v60  ;;  %v432_v12 = vmul.f32 %v3321_v40, %v413_v3  ;;  %v394_v50 = vadd.f32 %v386_v44, %v344_v33  ;;  %v433_v42 = vmul.f32 %v3322_v43, %v419_v48  ;;  %v414_v4 = vsel %vm412_vm8, %v3914_v46, %v411_v6 }
  0xf3   :  { %v420_v11 = vsel %vm412_vm8, %v411_v6, %v3937_v9  ;;  %980 = vmatprep.mubr.f32.mxu1 %v5329_v36  ;;  %v395_v51 = vadd.f32 %v387_v41, %v345_v8  ;;  %v436_v58 = vmul.f32 %v3325_v53, %v414_v4  ;;  %906 = vmatmul.mubr.f32.gmra.mxu0 %v3838_v10 }
  0xf4   :  { %v440_v5 = vadd.f32 %v432_v12, %v390_v16  ;;  %v437_v39 = vmul.f32 %v3326_v37, %v420_v11  ;;  %v441_v63 = vadd.f32 %v433_v42, %v391_v20  ;;  %1063 = vmatprep.mubr.f32.mxu0 %v5329_v36 }
  0xf5   :  { %v444_v7 = vadd.f32 %v436_v58, %v394_v50 }
  0xf6   :  { %v4265_v52 = vand.u32 4294901760, %v440_v5  ;;  %v445_v19 = vadd.f32 %v437_v39, %v395_v51  ;;  %982 = vmatmul.mubr.f32.vlgmr.msra.gmra.mxu1 %v3836_v61  ;;  %v1027_v46 = vand.u32 4294901760, %v441_v63 }
  0xf7   :  { %987 = vmatprep.mubr.f32.mxu1 %v5329_v36  ;;  %v1025_v35 = vand.u32 4294901760, %v444_v7 }
  0xf8   :  { %v1133_v9 = vsub.f32 %v440_v5, %v4265_v52  ;;  %v1023_v13 = vand.u32 4294901760, %v445_v19  ;;  %v1127_v31 = vsub.f32 %v441_v63, %v1027_v46 }
  0xf9   :  { %v1121_v27 = vsub.f32 %v444_v7, %v1025_v35 }
  0xfa   :  { %989 = vmatmul.mubr.f32.gmra.mxu1 %v3838_v10  ;;  %1024 = vmatprep.subr.mxu0 %v1023_v13  ;;  %v1115_v45 = vsub.f32 %v445_v19, %v1023_v13  ;;  %v1128_v25 = vand.u32 4294901760, %v1127_v31  ;;  %v1134_v1 = vand.u32 4294901760, %v1133_v9 }
  0xfb   :  { %1026 = vmatpush1.msra.mxu0 %v1025_v35  ;;  %1170 = vmatprep.mubr.f32.mxu1 %v5329_v36  ;;  %v1122_v62 = vand.u32 4294901760, %v1121_v27 }
  0xfc   :  { %1028 = vmatprep.subr.mxu0 %v1027_v46  ;;  %v1116_v29 = vand.u32 4294901760, %v1115_v45  ;;  %v1129_v2 = vsub.f32 %v1127_v31, %v1128_v25  ;;  %v1135_v26 = vsub.f32 %v1133_v9, %v1134_v1 }
  0xfd   :  { %1030 = vmatpush1.msra.mxu0 %v4265_v52  ;;  %v1123_v23 = vsub.f32 %v1121_v27, %v1122_v62 }
  0xfe   :  { %1069 = vmatmul.mubr.f32.vlgmr.msra.gmra.mxu0 %v4005_v0  ;;  %1215 = vmatprep.subr.mxu0 %v1115_v45  ;;  %v1117_v18 = vsub.f32 %v1115_v45, %v1116_v29  ;;  %v1130_v54 = vand.u32 4294901760, %v1129_v2  ;;  %v1136_v24 = vand.u32 4294901760, %v1135_v26 }
  0xff   :  { %1218 = vmatpush1.msra.mxu0 %v1121_v27  ;;  %1074 = vmatprep.mubr.f32.mxu0 %v5329_v36  ;;  %v1124_v14 = vand.u32 4294901760, %v1123_v23 }
 0x100   :  { %1221 = vmatprep.subr.mxu0 %v1127_v31  ;;  %v1118_v47 = vand.u32 4294901760, %v1117_v18 }
 0x101   :  { %1224 = vmatpush1.msra.mxu0 %v1133_v9 }
 0x102   :  { %1080 = vmatmul.mubr.f32.gmra.mxu0 %v4007_v30  ;;  %1119 = vmatprep.subr.mxu1 %v1118_v47 }
 0x103   :  { %1392 = vmatprep.subr.mxu0 %v1116_v29  ;;  %1125 = vmatpush1.msra.mxu1 %v1124_v14 }
 0x104   :  { %1131 = vmatprep.subr.mxu1 %v1130_v54  ;;  %1257 = vmatprep.mubr.f32.mxu0 %v5329_v36 }
 0x105   :  { %1137 = vmatpush1.msra.mxu1 %v1136_v24 }
 0x106   :  { %1172 = vmatmul.mubr.f32.vlgmr.msra.gmra.mxu1 %v3836_v61  ;;  %1260 = vmatmul.mubr.f32.vlgmr.msra.gmra.mxu0 %v3883_v28 }
 0x107   :  { %1303 = vmatprep.subr.mxu1 %v1023_v13  ;;  %1396 = vmatpush1.msra.mxu0 %v1122_v62 }
 0x108   :  { %1305 = vmatpush1.msra.mxu1 %v1025_v35  ;;  %1400 = vmatprep.subr.mxu0 %v1128_v25 }
 0x109   :  { %1307 = vmatprep.subr.mxu1 %v1027_v46  ;;  %1404 = vmatpush1.msra.mxu0 %v1134_v1 }
 0x10a   :  { %1177 = vmatprep.mubr.f32.mxu1 %v5329_v36  ;;  %1309 = vmatpush1.msra.mxu1 %v4265_v52 }
 0x10b   :  { %1179 = vmatmul.mubr.f32.gmra.mxu1 %v3838_v10  ;;  %1481 = vmatprep.subr.mxu1 %v1023_v13 }
 0x10c   :  { %1342 = vmatprep.mubr.f32.mxu1 %v5329_v36  ;;  %1265 = vmatprep.mubr.f32.mxu0 %v5329_v36 }
 0x10d   :  { %1268 = vmatmul.mubr.f32.gmra.mxu0 %v3886_v56 }
 0x10e   :  { %1437 = vmatprep.mubr.f32.mxu0 %v5329_v36 }
 0x10f   :  { %1346 = vmatmul.mubr.f32.vlgmr.msra.gmra.mxu1 %v3935_v32 }
 0x110   :  { %1483 = vmatpush1.msra.mxu1 %v1025_v35  ;;  %1351 = vmatprep.mubr.f32.mxu1 %v5329_v36 }
 0x111   :  { %1485 = vmatprep.subr.mxu1 %v1027_v46  ;;  %1439 = vmatmul.mubr.f32.vlgmr.msra.gmra.mxu0 %v3836_v61 }
 0x112   :  { %1487 = vmatpush1.msra.mxu1 %v4265_v52  ;;  %1444 = vmatprep.mubr.f32.mxu0 %v5329_v36 }
 0x113   :  { %1355 = vmatmul.mubr.f32.gmra.mxu1 %v3940_v60 }
 0x114   :  { %1520 = vmatprep.mubr.f32.mxu1 %v5329_v36 }
 0x115   :  { %1446 = vmatmul.mubr.f32.gmra.mxu0 %v3838_v10 }
 0x116   :  { %2035 = vmatprep.mubr.f32.mxu0 %v5329_v36 }
 0x117   :  { %1522 = vmatmul.mubr.f32.vlgmr.msra.gmra.mxu1 %v3836_v61 }
 0x118   :  { %1527 = vmatprep.mubr.f32.mxu1 %v5329_v36 }
 0x11b   :  { %1529 = vmatmul.mubr.f32.gmra.mxu1 %v3838_v10 }
 0x11c   :  { %2164 = vmatprep.mubr.f32.mxu1 %v5329_v36 }
 0x19a   :  { %v530_v28 = vpop.f32.mrf.mxu0 }
 0x19c   :  { %v532_v56 = vpop.f32.mrf.mxu0 }
 0x19f   :  { %v541_v32 = vpop.f32.mrf.mxu0 }
 0x1a1   :  { %v543_v0 = vpop.f32.mrf.mxu0 }
 0x1a3   :  { %v721_v30 = vpop.f32.mrf.mxu0 }
 0x1a5   :  { %v723_v17 = vpop.f32.mrf.mxu0 }
 0x1a6   :  { %v633_v60 = vpop.f32.mrf.mxu1 }
 0x1a7   :  { %v634_v21 = vadd.f32 %v633_v60, %v530_v28 }
 0x1a8   :  { %v635_v55 = vpop.f32.mrf.mxu1 }
 0x1a9   :  { %v722_v44 = vadd.f32 %v721_v30, %v634_v21  ;;  %v636_v57 = vadd.f32 %v635_v55, %v532_v56 }
 0x1aa   :  { %v640_v59 = vpop.f32.mrf.mxu1 }
 0x1ab   :  { %v729_v22 = vpop.f32.mrf.mxu0  ;;  %v724_v49 = vadd.f32 %v723_v17, %v636_v57  ;;  %v641_v37 = vadd.f32 %v640_v59, %v541_v32 }
 0x1ac   :  { %v642_v34 = vpop.f32.mrf.mxu1 }
 0x1ad   :  { %v731_v15 = vpop.f32.mrf.mxu0  ;;  %v730_v42 = vadd.f32 %v729_v22, %v641_v37  ;;  %v643_v1 = vadd.f32 %v642_v34, %v543_v0 }
 0x1ae   :  { %v807_v61 = vpop.f32.mrf.mxu1 }
 0x1af   :  { %v808_v10 = vadd.f32 %v807_v61, %v722_v44  ;;  %v900_v33 = vpop.f32.mrf.mxu0  ;;  %v732_v18 = vadd.f32 %v731_v15, %v643_v1 }
 0x1b0   :  { %v809_v40 = vpop.f32.mrf.mxu1 }
 0x1b1   :  { %v901_v6 = vadd.f32 %v900_v33, %v808_v10  ;;  %v902_v8 = vpop.f32.mrf.mxu0  ;;  %v810_v3 = vadd.f32 %v809_v40, %v724_v49 }
 0x1b2   :  { %v816_v41 = vpop.f32.mrf.mxu1 }
 0x1b3   :  { %v907_v48 = vpop.f32.mrf.mxu0  ;;  %v903_v50 = vadd.f32 %v902_v8, %v810_v3  ;;  %v817_v51 = vadd.f32 %v816_v41, %v730_v42 }
 0x1b4   :  { %v818_v43 = vpop.f32.mrf.mxu1 }
 0x1b5   :  { %v909_v11 = vpop.f32.mrf.mxu0  ;;  %v908_v63 = vadd.f32 %v907_v48, %v817_v51  ;;  %v819_v2 = vadd.f32 %v818_v43, %v732_v18 }
 0x1b6   :  { %v983_v16 = vpop.f32.mrf.mxu1 }
 0x1b7   :  { %v984_v53 = vadd.f32 %v983_v16, %v901_v6  ;;  %v910_v54 = vadd.f32 %v909_v11, %v819_v2 }
 0x1b8   :  { %v985_v12 = vpop.f32.mrf.mxu1 }
 0x1b9   :  { %v4299_v20 = vmax.f32 %v984_v53, 0.0  ;;  %v986_v4 = vadd.f32 %v985_v12, %v903_v50 }
 0x1ba   :  { %v990_v5 = vpop.f32.mrf.mxu1 }
 0x1bb   :  { %1632 = vrot.lane.b32.xlu1 %v4299_v20, %s3402_s30  ;;  %1543 = vrot.lane.b32.xlu0 %v4299_v20, %s3401_s21  ;;  %v4309_v39 = vmax.f32 %v986_v4, 0.0  ;;  %v991_v19 = vadd.f32 %v990_v5, %v908_v63 }
 0x1bc   :  { %v992_v52 = vpop.f32.mrf.mxu1 }
 0x1bd   :  { %v4319_v35 = vmax.f32 %v991_v19, 0.0  ;;  %v993_v56 = vadd.f32 %v992_v52, %v910_v54 }
 0x1be   :  { %v1070_v58 = vpop.f32.mrf.mxu0 }
 0x1bf   :  { %1681 = vrot.lane.b32.xlu1 %v4299_v20, %s3403_s8  ;;  %1583 = vrot.lane.b32.xlu0 %v4299_v20, %s3400_s20  ;;  %v4345_v60 = vmax.f32 %v993_v56, 0.0 }
 0x1c0   :  { %v1072_v7 = vpop.f32.mrf.mxu0 }
 0x1c2   :  { %v1081_v9 = vpop.f32.mrf.mxu0 }
 0x1c3   :  { %1755 = vrot.lane.b32.xlu1 %v4299_v20, %s3404_s11  ;;  %1636 = vrot.lane.b32.xlu0 %v4309_v39, %s3402_s30 }
 0x1c4   :  { %v1083_v31 = vpop.f32.mrf.mxu0 }
 0x1c6   :  { %v1173_v46 = vpop.f32.mrf.mxu1  ;;  %v1261_v25 = vpop.f32.mrf.mxu0 }
 0x1c7   :  { %1804 = vrot.lane.b32.xlu1 %v4299_v20, %s3405_s14  ;;  %1685 = vrot.lane.b32.xlu0 %v4309_v39, %s3403_s8  ;;  %v1174_v23 = vadd.f32 %v1173_v46, %v1070_v58 }
 0x1c8   :  { %v1175_v13 = vpop.f32.mrf.mxu1  ;;  %v1263_v29 = vpop.f32.mrf.mxu0 }
 0x1c9   :  { %v1262_v14 = vadd.f32 %v1261_v25, %v1174_v23  ;;  %v1176_v17 = vadd.f32 %v1175_v13, %v1072_v7 }
 0x1cb   :  { %1547 = vrot.lane.b32.xlu1 %v4309_v39, %s3401_s21  ;;  %1545 = vrot.lane.b32.xlu0 %v4319_v35, %s3401_s21  ;;  %v1180_v27 = vpop.f32.mrf.mxu1  ;;  %v1264_v22 = vadd.f32 %v1263_v29, %v1176_v17  ;;  %v3336_v29 = vld [vmem:[%s5294_s3 + $0x88] sm:$0xff] }
 0x1cc   :  { %v1181_v21 = vadd.f32 %v1180_v27, %v1081_v9 }
 0x1cd   :  { %v1182_v45 = vpop.f32.mrf.mxu1  ;;  %v1269_v26 = vpop.f32.mrf.mxu0 }
 0x1ce   :  { %v1270_v15 = vadd.f32 %v1269_v26, %v1181_v21  ;;  %v1183_v57 = vadd.f32 %v1182_v45, %v1083_v31  ;;  %v1568_v31 = vld [vmem:[%s5294_s3 + $0x8] sm:$0xff] }
 0x1cf   :  { %1587 = vrot.lane.b32.xlu1 %v4309_v39, %s3400_s20  ;;  %1585 = vrot.lane.b32.xlu0 %v4319_v35, %s3400_s20  ;;  %v1347_v62 = vpop.f32.mrf.mxu1  ;;  %v1271_v24 = vpop.f32.mrf.mxu0  ;;  %v3328_v45 = vld [vmem:[%s5294_s3 + $0x48] sm:$0xff] }
 0x1d0   :  { %v1348_v32 = vadd.f32 %v1347_v62, %v1262_v14  ;;  %v1272_v49 = vadd.f32 %v1271_v24, %v1183_v57  ;;  %v3344_v26 = vld [vmem:[%s5294_s3 + $0xc8] sm:$0xff] }
 0x1d1   :  { %v1349_v47 = vpop.f32.mrf.mxu1  ;;  %v1440_v30 = vpop.f32.mrf.mxu0 }
 0x1d2   :  { %v1441_v55 = vadd.f32 %v1440_v30, %v1348_v32  ;;  %v1350_v61 = vadd.f32 %v1349_v47, %v1264_v22 }
 0x1d3   :  { %1759 = vrot.lane.b32.xlu1 %v4309_v39, %s3404_s11  ;;  %1634 = vrot.lane.b32.xlu0 %v4319_v35, %s3402_s30  ;;  %v1356_v28 = vpop.f32.mrf.mxu1  ;;  %v1442_v40 = vpop.f32.mrf.mxu0 }
 0x1d4   :  { %v1357_v10 = vadd.f32 %v1356_v28, %v1270_v15  ;;  %v1443_v33 = vadd.f32 %v1442_v40, %v1350_v61 }
 0x1d5   :  { %v1358_v0 = vpop.f32.mrf.mxu1  ;;  %v1447_v43 = vpop.f32.mrf.mxu0 }
 0x1d6   :  { %v1448_v6 = vadd.f32 %v1447_v43, %v1357_v10  ;;  %v1359_v3 = vadd.f32 %v1358_v0, %v1272_v49 }
 0x1d7   :  { %1808 = vrot.lane.b32.xlu1 %v4309_v39, %s3405_s14  ;;  %1757 = vrot.lane.b32.xlu0 %v4319_v35, %s3404_s11  ;;  %v1523_v59 = vpop.f32.mrf.mxu1  ;;  %v1449_v48 = vpop.f32.mrf.mxu0 }
 0x1d8   :  { %v1524_v34 = vadd.f32 %v1523_v59, %v1441_v55  ;;  %v1450_v12 = vadd.f32 %v1449_v48, %v1359_v3  ;;  %v3327_v3 = vld [vmem:[%s5294_s3 + $0x40] sm:$0xff] }
 0x1d9   :  { %v1525_v41 = vpop.f32.mrf.mxu1 }
 0x1da   :  { %v4355_v44 = vmax.f32 %v1524_v34, 0.0  ;;  %v1526_v8 = vadd.f32 %v1525_v41, %v1443_v33 }
 0x1db   :  { %1857 = vrot.lane.b32.xlu1 %v4309_v39, %s3406_s0  ;;  %1806 = vrot.lane.b32.xlu0 %v4319_v35, %s3405_s14  ;;  %v1530_v16 = vpop.f32.mrf.mxu1 }
 0x1dc   :  { %v4369_v53 = vmax.f32 %v1526_v8, 0.0  ;;  %v1531_v37 = vadd.f32 %v1530_v16, %v1448_v6  ;;  %v3332_v6 = vld [vmem:[%s5294_s3 + $0x68] sm:$0xff]  ;;  %v1567_v16 = vld [vmem:[%s5294_s3] sm:$0xff] }
 0x1dd   :  { %v1532_v42 = vpop.f32.mrf.mxu1 }
 0x1de   :  { %v4375_v50 = vmax.f32 %v1531_v37, 0.0  ;;  %v1533_v4 = vadd.f32 %v1532_v42, %v1450_v12  ;;  %v1572_v12 = vld [vmem:[%s5294_s3 + $0x28] sm:$0xff] }
 0x1df   :  { %1683 = vrot.lane.b32.xlu1 %v4319_v35, %s3403_s8  ;;  %1855 = vrot.lane.b32.xlu0 %v4319_v35, %s3406_s0 }
 0x1e0   :  { %v4385_v11 = vmax.f32 %v1533_v4, 0.0  ;;  %v3340_v4 = vld [vmem:[%s5294_s3 + $0xa8] sm:$0xff] }
 0x1e2   :  { %5338 = vst [vmem:[#allocation2_spill] sm:$0xff] %v4385_v11 }
 0x1e3   :  { %1687 = vrot.lane.b32.xlu0 %v4345_v60, %s3403_s8  ;;  %1549 = vrot.lane.b32.xlu1 %v4345_v60, %s3401_s21 }
 0x1e7   :  { %1761 = vrot.lane.b32.xlu0 %v4345_v60, %s3404_s11  ;;  %1589 = vrot.lane.b32.xlu1 %v4345_v60, %s3400_s20 }
 0x1eb   :  { %1763 = vrot.lane.b32.xlu0 %v4355_v44, %s3404_s11  ;;  %1638 = vrot.lane.b32.xlu1 %v4345_v60, %s3402_s30 }
 0x1ef   :  { %1812 = vrot.lane.b32.xlu0 %v4355_v44, %s3405_s14  ;;  %1810 = vrot.lane.b32.xlu1 %v4345_v60, %s3405_s14 }
 0x1f3   :  { %1861 = vrot.lane.b32.xlu0 %v4355_v44, %s3406_s0  ;;  %1859 = vrot.lane.b32.xlu1 %v4345_v60, %s3406_s0 }
 0x1f7   :  { %1555 = vrot.lane.b32.xlu0 %v4369_v53, %s3401_s21  ;;  %1595 = vrot.lane.b32.xlu1 %v4369_v53, %s3400_s20 }
 0x1fb   :  { %1814 = vrot.lane.b32.xlu0 %v4375_v50, %s3405_s14  ;;  %1644 = vrot.lane.b32.xlu1 %v4369_v53, %s3402_s30 }
 0x1ff   :  { %1863 = vrot.lane.b32.xlu0 %v4375_v50, %s3406_s0  ;;  %1693 = vrot.lane.b32.xlu1 %v4369_v53, %s3403_s8 }
 0x203   :  { %1557 = vrot.lane.b32.xlu0 %v4385_v11, %s3401_s21  ;;  %1765 = vrot.lane.b32.xlu1 %v4375_v50, %s3404_s11 }
 0x207   :  { %1646 = vrot.lane.b32.xlu0 %v4385_v11, %s3402_s30  ;;  %1597 = vrot.lane.b32.xlu1 %v4385_v11, %s3400_s20 }
 0x20b   :  { %1695 = vrot.lane.b32.xlu0 %v4385_v11, %s3403_s8  ;;  %1908 = vrot.lane.b32.xlu1 %v4345_v60, %s3407_s15 }
 0x20f   :  { %1912 = vrot.lane.b32.xlu0 %v4375_v50, %s3407_s15  ;;  %1853 = vrot.lane.b32.xlu1 %v4299_v20, %s3406_s0 }
 0x213   :  { %1904 = vrot.lane.b32.xlu0 %v4319_v35, %s3407_s15  ;;  %1906 = vrot.lane.b32.xlu1 %v4309_v39, %s3407_s15 }
 0x217   :  { %1910 = vrot.lane.b32.xlu0 %v4355_v44, %s3407_s15  ;;  %1902 = vrot.lane.b32.xlu1 %v4299_v20, %s3407_s15 }
 0x21b   :  { %1553 = vrot.lane.b32.xlu0 %v4375_v50, %s3401_s21  ;;  %1593 = vrot.lane.b32.xlu1 %v4375_v50, %s3400_s20 }
 0x21f   :  { %1551 = vrot.lane.b32.xlu0 %v4355_v44, %s3401_s21  ;;  %1591 = vrot.lane.b32.xlu1 %v4355_v44, %s3400_s20 }
 0x223   :  { %1642 = vrot.lane.b32.xlu0 %v4375_v50, %s3402_s30  ;;  %1640 = vrot.lane.b32.xlu1 %v4355_v44, %s3402_s30 }
 0x227   :  { %1691 = vrot.lane.b32.xlu0 %v4375_v50, %s3403_s8  ;;  %1689 = vrot.lane.b32.xlu1 %v4355_v44, %s3403_s8 }
 0x22b   :  { %1769 = vrot.lane.b32.xlu0 %v4385_v11, %s3404_s11  ;;  %1767 = vrot.lane.b32.xlu1 %v4369_v53, %s3404_s11 }
 0x22d   :  { %v4431_v51 = vpop.permute.xlu1 %1632  ;;  %v1544_v5 = vpop.permute.xlu0 %1543 }
 0x22f   :  { %1818 = vrot.lane.b32.xlu0 %v4385_v11, %s3405_s14  ;;  %1816 = vrot.lane.b32.xlu1 %v4369_v53, %s3405_s14 }
 0x231   :  { %v4437_v58 = vpop.permute.xlu1 %1681  ;;  %v1584_v63 = vpop.permute.xlu0 %1583 }
 0x233   :  { %1867 = vrot.lane.b32.xlu0 %v4385_v11, %s3406_s0  ;;  %1865 = vrot.lane.b32.xlu1 %v4369_v53, %s3406_s0 }
 0x235   :  { %v4443_v52 = vpop.permute.xlu1 %1755  ;;  %v4445_v7 = vpop.permute.xlu0 %1636 }
 0x236   :  { %5339 = vst [vmem:[#allocation5_spill] sm:$0xff] %v4443_v52  ;;  %v1652_v62 = vsel %vm137_vm2, %v4431_v51, %v4445_v7 }
 0x237   :  { %1916 = vrot.lane.b32.xlu0 %v4385_v11, %s3407_s15  ;;  %1914 = vrot.lane.b32.xlu1 %v4369_v53, %s3407_s15  ;;  %v1666_v14 = vmul.f32 %v3336_v29, %v1652_v62 }
 0x239   :  { %v4451_v19 = vpop.permute.xlu1 %1804  ;;  %v4453_v46 = vpop.permute.xlu0 %1685 }
 0x23a   :  { %5340 = vst [vmem:[#allocation4_spill] sm:$0xff] %v4453_v46  ;;  %v1701_v47 = vsel %vm187_vm3, %v4437_v58, %v4453_v46 }
 0x23b   :  { %v1715_v56 = vmul.f32 %v3344_v26, %v1701_v47 }
 0x23d   :  { %v4455_v9 = vpop.permute.xlu1 %1547  ;;  %v4457_v13 = vpop.permute.xlu0 %1545 }
 0x23e   :  { %v1563_v27 = vsel %vm46_vm1, %v1544_v5, %v4455_v9 }
 0x23f   :  { %v1576_v23 = vmul.f32 %v1568_v31, %v1563_v27 }
 0x241   :  { %v4468_v25 = vpop.permute.xlu1 %1587  ;;  %v4470_v1 = vpop.permute.xlu0 %1585 }
 0x242   :  { %v1603_v18 = vsel %vm87_vm0, %v1584_v63, %v4468_v25 }
 0x243   :  { %v1617_v2 = vmul.f32 %v3328_v45, %v1603_v18 }
 0x245   :  { %v1625_v54 = vadd.f32 %v1617_v2, %v1576_v23  ;;  %v4489_v24 = vpop.permute.xlu1 %1759  ;;  %v4491_v28 = vpop.permute.xlu0 %1634  ;;  %v3335_v23 = vld [vmem:[%s5294_s3 + $0x80] sm:$0xff] }
 0x247   :  { %v1674_v32 = vadd.f32 %v1666_v14, %v1625_v54 }
 0x249   :  { %v4493_v0 = vpop.permute.xlu1 %1808  ;;  %v4495_v30 = vpop.permute.xlu0 %1757  ;;  %v4497_v17 = vadd.f32 %v1715_v56, %v1674_v32  ;;  %v3348_v32 = vld [vmem:[%s5294_s3 + $0xe8] sm:$0xff] }
 0x24d   :  { %v4499_v55 = vpop.permute.xlu1 %1857  ;;  %v4501_v59 = vpop.permute.xlu0 %1806 }
 0x251   :  { %v4503_v21 = vpop.permute.xlu1 %1683  ;;  %v4505_v22 = vpop.permute.xlu0 %1855 }
 0x255   :  { %v4507_v34 = vpop.permute.xlu0 %1687  ;;  %v4509_v15 = vpop.permute.xlu1 %1549 }
 0x256   :  { %v1564_v42 = vsel %vm46_vm1, %v4457_v13, %v4509_v15 }
 0x257   :  { %v1580_v2 = vmul.f32 %v1572_v12, %v1564_v42  ;;  %v3351_v42 = vld [vmem:[%s5294_s3 + $0x100] sm:$0xff] }
 0x259   :  { %v4511_v61 = vpop.permute.xlu0 %1761  ;;  %v4513_v40 = vpop.permute.xlu1 %1589 }
 0x25a   :  { %v1604_v8 = vsel %vm87_vm0, %v4470_v1, %v4513_v40 }
 0x25b   :  { %v1621_v29 = vmul.f32 %v3332_v6, %v1604_v8  ;;  %v1702_v6 = vsel %vm187_vm3, %v4503_v21, %v4507_v34  ;;  %v3343_v8 = vld [vmem:[%s5294_s3 + $0xc0] sm:$0xff] }
 0x25d   :  { %v4515_v57 = vpop.permute.xlu0 %1763  ;;  %v4517_v10 = vpop.permute.xlu1 %1638 }
 0x25e   :  { %v1653_v31 = vsel %vm137_vm2, %v4491_v28, %v4517_v10 }
 0x25f   :  { %v1670_v26 = vmul.f32 %v3340_v4, %v1653_v31  ;;  %v1951_v31 = vld [vmem:[%s5295_s4] sm:$0xff] }
 0x261   :  { %v4519_v33 = vpop.permute.xlu0 %1812  ;;  %v4521_v41 = vpop.permute.xlu1 %1810 }
 0x265   :  { %v4523_v43 = vpop.permute.xlu0 %1861  ;;  %v4525_v49 = vpop.permute.xlu1 %1859 }
 0x266   :  { %5341 = vst [vmem:[#allocation3_spill] sm:$0xff] %v4523_v43 }
 0x269   :  { %v4540_v37 = vpop.permute.xlu0 %1555  ;;  %v4542_v48 = vpop.permute.xlu1 %1595 }
 0x26a   :  { %v1565_v27 = vsel %vm46_vm1, %v4540_v37, %v1544_v5  ;;  %v1605_v45 = vsel %vm87_vm0, %v4542_v48, %v1584_v63  ;;  %v1629_v63 = vadd.f32 %v1621_v29, %v1580_v2  ;;  %v3359_v29 = vld [vmem:[%s5294_s3 + $0x140] sm:$0xff]  ;;  %v1739_v2 = vmul.f32 %v3351_v42, %v4299_v20  ;;  %v3352_v20 = vld [vmem:[%s5294_s3 + $0x108] sm:$0xff] }
 0x26b   :  { %v1575_v62 = vmul.f32 %v1567_v16, %v1565_v27  ;;  %v1616_v18 = vmul.f32 %v3327_v3, %v1605_v45  ;;  %v1719_v27 = vmul.f32 %v3348_v32, %v1702_v6  ;;  %v1952_v32 = vld [vmem:[%s5295_s4 + $0x8] sm:$0xff]  ;;  %v1571_v42 = vld [vmem:[%s5294_s3 + $0x20] sm:$0xff] }
 0x26c   :  { %v1678_v16 = vadd.f32 %v1670_v26, %v1629_v63  ;;  %v1956_v63 = vsel %vm448_vm6, %v1951_v31, 0  ;;  %v3331_v31 = vld [vmem:[%s5294_s3 + $0x60] sm:$0xff] }
 0x26d   :  { %v1624_v47 = vadd.f32 %v1616_v18, %v1575_v62  ;;  %v4567_v14 = vpop.permute.xlu0 %1814  ;;  %v4569_v54 = vpop.permute.xlu1 %1644  ;;  %v1775_v62 = vsel %vm262_vm4, %v4443_v52, %v4489_v24  ;;  %v3356_v18 = vld [vmem:[%s5294_s3 + $0x128] sm:$0xff] }
 0x26e   :  { %5342 = vst [vmem:[#allocation6_spill] sm:$0xff] %v4567_v14  ;;  %v1654_v5 = vsel %vm137_vm2, %v4569_v54, %v4431_v51  ;;  %v1788_v6 = vmul.f32 %v3359_v29, %v1775_v62 }
 0x26f   :  { %v1665_v56 = vmul.f32 %v3335_v23, %v1654_v5  ;;  %v1727_v23 = vadd.f32 %v1719_v27, %v1678_v16  ;;  %v1744_v16 = vmul.f32 %v3356_v18, %v4345_v60  ;;  %v3355_v27 = vld [vmem:[%s5294_s3 + $0x120] sm:$0xff] }
 0x270   :  { %v1743_v52 = vmul.f32 %v3355_v27, %v4319_v35 }
 0x271   :  { %v1673_v3 = vadd.f32 %v1665_v56, %v1624_v47  ;;  %v4585_v12 = vpop.permute.xlu0 %1863  ;;  %v4587_v51 = vpop.permute.xlu1 %1693  ;;  %v1752_v60 = vadd.f32 %v1744_v16, %v1727_v23  ;;  %v3372_v23 = vld [vmem:[%s5294_s3 + $0x1a8] sm:$0xff] }
 0x272   :  { %5343 = vst [vmem:[#allocation7_spill] sm:$0xff] %v4585_v12  ;;  %v1703_v4 = vsel %vm187_vm3, %v4587_v51, %v4437_v58  ;;  %v3364_v58 = vld [vmem:[%s5294_s3 + $0x168] sm:$0xff] }
 0x273   :  { %v1714_v45 = vmul.f32 %v3343_v8, %v1703_v4 }
 0x275   :  { %v1722_v26 = vadd.f32 %v1714_v45, %v1673_v3  ;;  %v4613_v47 = vpop.permute.xlu0 %1557  ;;  %v4615_v5 = vpop.permute.xlu1 %1765  ;;  %v4642_v45 = vand.u32 4294901760, %v1956_v63 }
 0x276   :  { %5344 = vst [vmem:[#allocation8_spill] sm:$0xff] %v4615_v5  ;;  %v1774_v56 = vsel %vm262_vm4, %v4511_v61, %v4615_v5  ;;  %v1566_v4 = vsel %vm46_vm1, %v4613_v47, %v4457_v13  ;;  %v3353_v13 = vld [vmem:[%s5294_s3 + $0x110] sm:$0xff] }
 0x277   :  { %v1747_v8 = vadd.f32 %v1739_v2, %v1722_v26  ;;  %v1793_v3 = vmul.f32 %v3364_v58, %v1774_v56  ;;  %v1959_v58 = vsel %vm448_vm6, %v1952_v32, 0  ;;  %v3354_v2 = vld [vmem:[%s5294_s3 + $0x118] sm:$0xff]  ;;  %v1740_v26 = vmul.f32 %v3352_v20, %v4309_v39  ;;  %v3339_v32 = vld [vmem:[%s5294_s3 + $0xa0] sm:$0xff]  ;;  %v1953_v20 = vld [vmem:[%s5295_s4 + $0x10] sm:$0xff] }
 0x278   :  { %v1823_v56 = vsel %vm312_vm5, %v4521_v41, %v4567_v14  ;;  %v3357_v5 = vld [vmem:[%s5294_s3 + $0x130] sm:$0xff]  ;;  %v4687_v11 = vsub.f32 %v1956_v63, %v4642_v45  ;;  %v4692_v46 = vmul.f32 %v3353_v13, %v4355_v44  ;;  %v3363_v63 = vld [vmem:[%s5294_s3 + $0x160] sm:$0xff]  ;;  %v1776_v44 = vsel %vm262_vm4, %v4495_v30, %v4511_v61  ;;  %v3360_v61 = vld [vmem:[%s5294_s3 + $0x148] sm:$0xff] }
 0x279   :  { %v4644_v29 = vpop.permute.xlu0 %1646  ;;  %v4646_v62 = vpop.permute.xlu1 %1597  ;;  %v4648_v18 = vadd.f32 %v1788_v6, %v1747_v8  ;;  %v1579_v8 = vmul.f32 %v1571_v42, %v1566_v4  ;;  %v1801_v16 = vadd.f32 %v1793_v3, %v1752_v60  ;;  %v4695_v3 = vmul.f32 %v3354_v2, %v4369_v53  ;;  %v3380_v53 = vld [vmem:[%s5294_s3 + $0x1e8] sm:$0xff] }
 0x27a   :  { %v1655_v6 = vsel %vm137_vm2, %v4644_v29, %v4491_v28  ;;  %v1606_v39 = vsel %vm87_vm0, %v4646_v62, %v4470_v1  ;;  %v3347_v28 = vld [vmem:[%s5294_s3 + $0xe0] sm:$0xff]  ;;  %v4689_v1 = vand.u32 4294901760, %v1959_v58  ;;  %v1842_v35 = vmul.f32 %v3372_v23, %v1823_v56 }
 0x27b   :  { %v1620_v14 = vmul.f32 %v3331_v31, %v1606_v39  ;;  %v1669_v42 = vmul.f32 %v3339_v32, %v1655_v6  ;;  %v1962_v60 = vsel %vm448_vm6, %v1953_v20, 0  ;;  %v4719_v2 = vmul.f32 %v3357_v5, %v4375_v50  ;;  %v3388_v50 = vld [vmem:[%s5294_s3 + $0x228] sm:$0xff] }
 0x27c   :  { %v1773_v23 = vsel %vm262_vm4, %v4489_v24, %v4515_v57  ;;  %v1850_v56 = vadd.f32 %v1842_v35, %v1801_v16  ;;  %v4736_v5 = vand.u32 4294901760, %v4687_v11  ;;  %v4739_v39 = vsub.f32 %v1959_v58, %v4689_v1  ;;  %v3367_v58 = vld [vmem:[%s5294_s3 + $0x180] sm:$0xff] }
 0x27d   :  { %v1628_v4 = vadd.f32 %v1620_v14, %v1579_v8  ;;  %v4697_v31 = vpop.permute.xlu0 %1695  ;;  %v1909_v27 = vpop.permute.xlu1 %1908  ;;  %v1872_v14 = vsel %vm362_vm7, %v4525_v49, %v4585_v12  ;;  %v4741_v20 = vand.u32 4294901760, %v1962_v60  ;;  %v1792_v24 = vmul.f32 %v3363_v63, %v1776_v44  ;;  %v3368_v8 = vld [vmem:[%s5294_s3 + $0x188] sm:$0xff]  ;;  %v3371_v44 = vld [vmem:[%s5294_s3 + $0x1a0] sm:$0xff] }
 0x27e   :  { %v1704_v13 = vsel %vm187_vm3, %v4697_v31, %v4503_v21  ;;  %v1824_v21 = vsel %vm312_vm5, %v4451_v19, %v4493_v0  ;;  %v1822_v16 = vsel %vm312_vm5, %v4493_v0, %v4519_v33  ;;  %v1789_v63 = vmul.f32 %v3360_v61, %v1773_v23 }
 0x27f   :  { %v1677_v32 = vadd.f32 %v1669_v42, %v1628_v4  ;;  %v1718_v6 = vmul.f32 %v3347_v28, %v1704_v13  ;;  %v1891_v28 = vmul.f32 %v3380_v53, %v1872_v14  ;;  %v1825_v0 = vsel %vm312_vm5, %v4501_v59, %v4521_v41  ;;  %v3376_v13 = vld [vmem:[%s5294_s3 + $0x1c8] sm:$0xff]  ;;  %v3375_v41 = vld [vmem:[%s5294_s3 + $0x1c0] sm:$0xff] }
 0x280   :  { %v1871_v53 = vsel %vm362_vm7, %v4499_v55, %v4523_v43  ;;  %v1748_v43 = vadd.f32 %v1740_v26, %v4497_v17  ;;  %v1838_v12 = vmul.f32 %v3368_v8, %v1822_v16 }
 0x281   :  { %v1726_v35 = vadd.f32 %v1718_v6, %v1677_v32  ;;  %v4750_v42 = vpop.permute.xlu0 %1912  ;;  %v4752_v4 = vpop.permute.xlu1 %1853  ;;  %v1899_v23 = vadd.f32 %v1891_v28, %v1850_v56  ;;  %v4790_v56 = vsub.f32 %v1962_v60, %v4741_v20  ;;  %v1841_v28 = vmul.f32 %v3371_v44, %v1825_v0  ;;  %v1954_v60 = vld [vmem:[%s5295_s4 + $0x18] sm:$0xff]  ;;  %v3384_v0 = vld [vmem:[%s5294_s3 + $0x208] sm:$0xff] }
 0x282   :  { %5345 = vst [vmem:[#allocation9_spill] sm:$0xff] %v4750_v42  ;;  %5346 = vst [vmem:[#allocation10_spill] sm:$0xff] %v4752_v4  ;;  %v1921_v14 = vsel %vm412_vm8, %v1909_v27, %v4750_v42  ;;  %v1873_v6 = vsel %vm362_vm7, %v4752_v4, %v4499_v55  ;;  %v3379_v42 = vld [vmem:[%s5294_s3 + $0x1e0] sm:$0xff]  ;;  %v1797_v26 = vadd.f32 %v1789_v63, %v1748_v43 }
 0x283   :  { %v1751_v61 = vadd.f32 %v1743_v52, %v1726_v35  ;;  %v1940_v32 = vmul.f32 %v3388_v50, %v1921_v14  ;;  %v1874_v52 = vsel %vm362_vm7, %v4505_v22, %v4525_v49  ;;  %v1837_v50 = vmul.f32 %v3367_v58, %v1824_v21  ;;  %v3387_v4 = vld [vmem:[%s5294_s3 + $0x220] sm:$0xff] }
 0x284   :  { %v1887_v8 = vmul.f32 %v3376_v13, %v1871_v53  ;;  %v1886_v16 = vmul.f32 %v3375_v41, %v1873_v6  ;;  %v1890_v21 = vmul.f32 %v3379_v42, %v1874_v52  ;;  %v2039_v43 = vsub.f32 %v4687_v11, %v4736_v5 }
 0x285   :  { %v1800_v35 = vadd.f32 %v1792_v24, %v1751_v61  ;;  %v1948_v14 = vadd.f32 %v1940_v32, %v1899_v23  ;;  %v4792_v55 = vpop.permute.xlu0 %1904  ;;  %v1907_v17 = vpop.permute.xlu1 %1906  ;;  %v1846_v63 = vadd.f32 %v1838_v12, %v1797_v26  ;;  %v1845_v44 = vadd.f32 %v1837_v50, %v4648_v18  ;;  %v1573_v26 = vld [vmem:[%s5294_s3 + $0x30] sm:$0xff] }
 0x286   :  { %v1923_v49 = vsel %vm412_vm8, %v4792_v55, %v1909_v27  ;;  %v3383_v27 = vld [vmem:[%s5294_s3 + $0x200] sm:$0xff]  ;;  %v4815_v53 = vand.u32 4294901760, %v4739_v39  ;;  %v4818_v42 = vand.u32 4294901760, %v4790_v56  ;;  %v1965_v32 = vsel %vm448_vm6, %v1954_v60, 0 }
 0x287   :  { %v4803_v24 = vand.u32 4294901760, %v1948_v14  ;;  %v1849_v58 = vadd.f32 %v1841_v28, %v1800_v35  ;;  %v1939_v61 = vmul.f32 %v3387_v4, %v1923_v49  ;;  %v1895_v41 = vadd.f32 %v1887_v8, %v1846_v63  ;;  %v1574_v63 = vld [vmem:[%s5294_s3 + $0x38] sm:$0xff] }
 0x288   :  { %5347 = vst [vmem:[#allocation11_spill] sm:$0xff] %v4815_v53  ;;  %5348 = vst [vmem:[#allocation12_spill] sm:$0xff] %v4818_v42  ;;  %v1894_v6 = vadd.f32 %v1886_v16, %v1845_v44  ;;  %v4839_v49 = vand.u32 4294901760, %v2039_v43  ;;  %v2050_v8 = vsub.f32 %v4739_v39, %v4815_v53  ;;  %v2061_v16 = vsub.f32 %v4790_v56, %v4818_v42  ;;  %v3333_v43 = vld [vmem:[%s5294_s3 + $0x70] sm:$0xff] }
 0x289   :  { %v4821_v13 = vsub.f32 %v1948_v14, %v4803_v24  ;;  %v1898_v12 = vadd.f32 %v1890_v21, %v1849_v58  ;;  %v4823_v18 = vpop.permute.xlu0 %1910  ;;  %v4825_v23 = vpop.permute.xlu1 %1902  ;;  %1996 = vmatprep.subr.mxu0 %v4803_v24  ;;  %v4845_v60 = vand.u32 4294901760, %v1965_v32 }
 0x28a   :  { %v1920_v52 = vsel %vm412_vm8, %v1907_v17, %v4823_v18  ;;  %v1922_v50 = vsel %vm412_vm8, %v4825_v23, %v1907_v17 }
 0x28b   :  { %v1947_v28 = vadd.f32 %v1939_v61, %v1898_v12  ;;  %v1936_v4 = vmul.f32 %v3384_v0, %v1920_v52  ;;  %v1935_v35 = vmul.f32 %v3383_v27, %v1922_v50  ;;  %v5316_v14 = vand.u32 4294901760, %v4821_v13 }
 0x28d   :  { %v4847_v17 = vand.u32 4294901760, %v1947_v28  ;;  %v1944_v21 = vadd.f32 %v1936_v4, %v1895_v41  ;;  %v1943_v58 = vadd.f32 %v1935_v35, %v1894_v6  ;;  %v1554_v44 = vpop.permute.xlu0 %1553  ;;  %v1594_v0 = vpop.permute.xlu1 %1593  ;;  %v2111_v27 = vsub.f32 %v4821_v13, %v5316_v14  ;;  %v3334_v41 = vld [vmem:[%s5294_s3 + $0x78] sm:$0xff] }
 0x28e   :  { %v1560_v12 = vsel %vm46_vm1, %v1554_v44, %v4613_v47  ;;  %v1562_v61 = vsel %vm46_vm1, %v4509_v15, %v1554_v44  ;;  %v1600_v6 = vsel %vm87_vm0, %v1594_v0, %v4646_v62  ;;  %v1602_v52 = vsel %vm87_vm0, %v4513_v40, %v1594_v0  ;;  %v1569_v62 = vld [vmem:[%s5294_s3 + $0x10] sm:$0xff]  ;;  %v1570_v40 = vld [vmem:[%s5294_s3 + $0x18] sm:$0xff] }
 0x28f   :  { %v4874_v50 = vsub.f32 %v1947_v28, %v4847_v17  ;;  %v4876_v47 = vand.u32 4294901760, %v1944_v21  ;;  %v4878_v4 = vand.u32 4294901760, %v1943_v58  ;;  %v1581_v15 = vmul.f32 %v1573_v26, %v1562_v61  ;;  %1998 = vmatpush1.msra.mxu0 %v4847_v17 }
 0x290   :  { %v1582_v35 = vmul.f32 %v1574_v63, %v1560_v12  ;;  %v1622_v44 = vmul.f32 %v3333_v43, %v1602_v52  ;;  %v2112_v0 = vand.u32 4294901760, %v2111_v27  ;;  %v4888_v28 = vsub.f32 %v1965_v32, %v4845_v60  ;;  %v3329_v63 = vld [vmem:[%s5294_s3 + $0x50] sm:$0xff]  ;;  %v3330_v43 = vld [vmem:[%s5294_s3 + $0x58] sm:$0xff] }
 0x291   :  { %v4891_v14 = vsub.f32 %v1943_v58, %v4878_v4  ;;  %v1623_v26 = vmul.f32 %v3334_v41, %v1600_v6  ;;  %v1552_v61 = vpop.permute.xlu0 %1551  ;;  %v1592_v12 = vpop.permute.xlu1 %1591  ;;  %2000 = vmatprep.subr.mxu0 %v4876_v47  ;;  %v4901_v27 = vsub.f32 %v1944_v21, %v4876_v47  ;;  %v5321_v32 = vand.u32 4294901760, %v4874_v50 }
 0x292   :  { %v1630_v58 = vadd.f32 %v1622_v44, %v1581_v15  ;;  %v1559_v41 = vsel %vm46_vm1, %v1552_v61, %v4540_v37  ;;  %v1561_v6 = vsel %vm46_vm1, %v4455_v9, %v1552_v61  ;;  %2113 = vmatprep.subr.mxu1 %v2112_v0  ;;  %v4910_v52 = vand.u32 4294901760, %v2050_v8  ;;  %2002 = vmatpush1.msra.mxu0 %v4878_v4  ;;  %v3341_v9 = vld [vmem:[%s5294_s3 + $0xb0] sm:$0xff]  ;;  %v3338_v61 = vld [vmem:[%s5294_s3 + $0x98] sm:$0xff] }
 0x293   :  { %v1577_v42 = vmul.f32 %v1569_v62, %v1561_v6  ;;  %v1578_v53 = vmul.f32 %v1570_v40, %v1559_v41  ;;  %v1599_v21 = vsel %vm87_vm0, %v1592_v12, %v4542_v48  ;;  %v1601_v15 = vsel %vm87_vm0, %v4468_v25, %v1592_v12  ;;  %2041 = vmatmul.mubr.f32.vlgmr.msra.gmra.mxu0 %v4839_v49  ;;  %v3342_v48 = vld [vmem:[%s5294_s3 + $0xb8] sm:$0xff]  ;;  %v3337_v0 = vld [vmem:[%s5294_s3 + $0x90] sm:$0xff] }
 0x294   :  { %v1618_v37 = vmul.f32 %v3329_v63, %v1601_v15  ;;  %v1619_v44 = vmul.f32 %v3330_v43, %v1599_v21  ;;  %2223 = vmatprep.subr.mxu0 %v4821_v13  ;;  %v2117_v25 = vsub.f32 %v4874_v50, %v5321_v32  ;;  %v2122_v8 = vand.u32 4294901760, %v4901_v27  ;;  %2046 = vmatprep.mubr.f32.mxu0 %v5329_v36 }
 0x295   :  { %v1631_v62 = vadd.f32 %v1623_v26, %v1582_v35  ;;  %2226 = vmatpush1.msra.mxu0 %v4874_v50  ;;  %v1643_v40 = vpop.permute.xlu0 %1642  ;;  %v1641_v63 = vpop.permute.xlu1 %1640  ;;  %v2128_v43 = vand.u32 4294901760, %v4891_v14  ;;  %v4940_v12 = vand.u32 4294901760, %v2061_v16  ;;  %v4943_v35 = vand.u32 4294901760, %v4888_v28 }
 0x296   :  { %v1626_v26 = vadd.f32 %v1618_v37, %v1577_v42  ;;  %v1627_v41 = vadd.f32 %v1619_v44, %v1578_v53  ;;  %v1649_v6 = vsel %vm137_vm2, %v1643_v40, %v4644_v29  ;;  %v1651_v21 = vsel %vm137_vm2, %v4517_v10, %v1643_v40  ;;  %2229 = vmatprep.subr.mxu0 %v4901_v27  ;;  %v3349_v44 = vld [vmem:[%s5294_s3 + $0xf0] sm:$0xff] }
 0x297   :  { %v1671_v15 = vmul.f32 %v3341_v9, %v1651_v21  ;;  %v1672_v32 = vmul.f32 %v3342_v48, %v1649_v6  ;;  %v1648_v16 = vsel %vm137_vm2, %v1641_v63, %v4569_v54  ;;  %v1650_v53 = vsel %vm137_vm2, %v4445_v7, %v1641_v63  ;;  %2232 = vmatpush1.msra.mxu0 %v4891_v14  ;;  %v3350_v54 = vld [vmem:[%s5294_s3 + $0xf8] sm:$0xff] }
 0x298   :  { %v1667_v42 = vmul.f32 %v3337_v0, %v1650_v53  ;;  %v1668_v29 = vmul.f32 %v3338_v61, %v1648_v16  ;;  %2052 = vmatmul.mubr.f32.gmra.mxu0 %v4910_v52  ;;  %v2118_v37 = vand.u32 4294901760, %v2117_v25  ;;  %v5349_v10 = vand.u32 4294901760, %v4821_v13  ;;  %v3345_v13 = vld [vmem:[%s5294_s3 + $0xd0] sm:$0xff]  ;;  %v3346_v25 = vld [vmem:[%s5294_s3 + $0xd8] sm:$0xff] }
 0x299   :  { %v2123_v7 = vsub.f32 %v4901_v27, %v2122_v8  ;;  %v1679_v9 = vadd.f32 %v1671_v15, %v1630_v58  ;;  %v1680_v48 = vadd.f32 %v1672_v32, %v1631_v62  ;;  %v1692_v40 = vpop.permute.xlu0 %1691  ;;  %v1690_v0 = vpop.permute.xlu1 %1689  ;;  %2057 = vmatprep.mubr.f32.mxu0 %v5329_v36  ;;  %v2129_v61 = vsub.f32 %v4891_v14, %v2128_v43  ;;  %v3358_v21 = vld [vmem:[%s5294_s3 + $0x138] sm:$0xff] }
 0x29a   :  { %2434 = vmatprep.subr.mxu0 %v5349_v10  ;;  %v2072_v58 = vsub.f32 %v4888_v28, %v4943_v35  ;;  %v1675_v32 = vadd.f32 %v1667_v42, %v1626_v26  ;;  %v1676_v62 = vadd.f32 %v1668_v29, %v1627_v41  ;;  %2119 = vmatpush1.msra.mxu1 %v2118_v37  ;;  %v5350_v41 = vld [vmem:[#allocation4_spill] sm:$0xff]  ;;  %v3366_v10 = vld [vmem:[%s5294_s3 + $0x178] sm:$0xff] }
 0x29b   :  { %v1698_v63 = vsel %vm187_vm3, %v1692_v40, %v4697_v31  ;;  %v1700_v6 = vsel %vm187_vm3, %v4507_v34, %v1692_v40  ;;  %v1697_v26 = vsel %vm187_vm3, %v1690_v0, %v4587_v51  ;;  %v1699_v53 = vsel %vm187_vm3, %v5350_v41, %v1690_v0  ;;  %v3365_v34 = vld [vmem:[%s5294_s3 + $0x170] sm:$0xff] }
 0x29c   :  { %v1720_v15 = vmul.f32 %v3349_v44, %v1700_v6  ;;  %v1721_v16 = vmul.f32 %v3350_v54, %v1698_v63  ;;  %v1716_v42 = vmul.f32 %v3345_v13, %v1699_v53  ;;  %v1717_v31 = vmul.f32 %v3346_v25, %v1697_v26  ;;  %2063 = vmatmul.mubr.f32.gmra.mxu0 %v4940_v12  ;;  %v5351_v54 = vld [vmem:[#allocation2_spill] sm:$0xff]  ;;  %v3374_v26 = vld [vmem:[%s5294_s3 + $0x1b8] sm:$0xff] }
 0x29d   :  { %v2124_v29 = vand.u32 4294901760, %v2123_v7  ;;  %v2130_v37 = vand.u32 4294901760, %v2129_v61  ;;  %v1746_v40 = vmul.f32 %v3358_v21, %v5351_v54  ;;  %v1770_v63 = vpop.permute.xlu0 %1769  ;;  %v1768_v0 = vpop.permute.xlu1 %1767  ;;  %2068 = vmatprep.mubr.f32.mxu0 %v5329_v36  ;;  %v5007_v7 = vand.u32 4294901760, %v2072_v58  ;;  %v5352_v61 = vld [vmem:[#allocation8_spill] sm:$0xff] }
 0x29e   :  { %v1728_v44 = vadd.f32 %v1720_v15, %v1679_v9  ;;  %v1729_v51 = vadd.f32 %v1721_v16, %v1680_v48  ;;  %v1724_v13 = vadd.f32 %v1716_v42, %v1675_v32  ;;  %v1725_v25 = vadd.f32 %v1717_v31, %v1676_v62  ;;  %v3361_v48 = vld [vmem:[%s5294_s3 + $0x150] sm:$0xff]  ;;  %v3362_v62 = vld [vmem:[%s5294_s3 + $0x158] sm:$0xff] }
 0x29f   :  { %2125 = vmatprep.subr.mxu1 %v2124_v29  ;;  %v1772_v6 = vsel %vm262_vm4, %v5352_v61, %v1770_v63  ;;  %v1778_v9 = vsel %vm262_vm4, %v1770_v63, %v4495_v30  ;;  %v1771_v16 = vsel %vm262_vm4, %v4515_v57, %v1768_v0  ;;  %v5353_v42 = vld [vmem:[#allocation5_spill] sm:$0xff] }
 0x2a0   :  { %2131 = vmatpush1.msra.mxu1 %v2130_v37  ;;  %v1753_v21 = vadd.f32 %v4719_v2, %v1728_v44  ;;  %v1754_v58 = vadd.f32 %v1746_v40, %v1729_v51  ;;  %v1794_v15 = vmul.f32 %v3365_v34, %v1772_v6  ;;  %v1795_v32 = vmul.f32 %v3366_v10, %v1778_v9  ;;  %v3373_v2 = vld [vmem:[%s5294_s3 + $0x1b0] sm:$0xff]  ;;  %v5354_v34 = vld [vmem:[#allocation6_spill] sm:$0xff]  ;;  %v3370_v51 = vld [vmem:[%s5294_s3 + $0x198] sm:$0xff] }
 0x2a1   :  { %2166 = vmatmul.mubr.f32.vlgmr.msra.gmra.mxu1 %v4642_v45  ;;  %2327 = vmatprep.subr.mxu1 %v4803_v24  ;;  %v1749_v30 = vadd.f32 %v4692_v46, %v1724_v13  ;;  %v1750_v53 = vadd.f32 %v4695_v3, %v1725_v25  ;;  %v1777_v46 = vsel %vm262_vm4, %v1768_v0, %v5353_v42  ;;  %v1819_v29 = vpop.permute.xlu0 %1818  ;;  %v1817_v57 = vpop.permute.xlu1 %1816  ;;  %v3369_v44 = vld [vmem:[%s5294_s3 + $0x190] sm:$0xff]  ;;  %v3382_v61 = vld [vmem:[%s5294_s3 + $0x1f8] sm:$0xff] }
 0x2a2   :  { %2329 = vmatpush1.msra.mxu1 %v4847_v17  ;;  %v1802_v41 = vadd.f32 %v1794_v15, %v1753_v21  ;;  %v1790_v31 = vmul.f32 %v3361_v48, %v1771_v16  ;;  %v1791_v37 = vmul.f32 %v3362_v62, %v1777_v46  ;;  %2171 = vmatprep.mubr.f32.mxu1 %v5329_v36  ;;  %v3381_v25 = vld [vmem:[%s5294_s3 + $0x1f0] sm:$0xff]  ;;  %v5355_v15 = vld [vmem:[#allocation7_spill] sm:$0xff] }
 0x2a3   :  { %2331 = vmatprep.subr.mxu1 %v4876_v47  ;;  %v1821_v10 = vsel %vm312_vm5, %v5354_v34, %v1819_v29  ;;  %v1827_v3 = vsel %vm312_vm5, %v1819_v29, %v4501_v59  ;;  %v1803_v54 = vadd.f32 %v1795_v32, %v1754_v58  ;;  %2074 = vmatmul.mubr.f32.gmra.mxu0 %v5007_v7  ;;  %v5358_v29 = vand.u32 4294901760, %v4874_v50  ;;  %v3385_v50 = vld [vmem:[%s5294_s3 + $0x210] sm:$0xff] }
 0x2a4   :  { %2333 = vmatpush1.msra.mxu1 %v4878_v4  ;;  %v1843_v40 = vmul.f32 %v3373_v2, %v1821_v10  ;;  %v1844_v63 = vmul.f32 %v3374_v26, %v1827_v3  ;;  %v1798_v0 = vadd.f32 %v1790_v31, %v1749_v30  ;;  %v1820_v59 = vsel %vm312_vm5, %v4519_v33, %v1817_v57  ;;  %v3377_v33 = vld [vmem:[%s5294_s3 + $0x1d0] sm:$0xff]  ;;  %v5356_v30 = vld [vmem:[#allocation3_spill] sm:$0xff]  ;;  %v5357_v2 = vld [vmem:[#allocation10_spill] sm:$0xff] }
 0x2a5   :  { %2173 = vmatmul.mubr.f32.gmra.mxu1 %v4689_v1  ;;  %2537 = vmatprep.subr.mxu1 %v4803_v24  ;;  %v1826_v13 = vsel %vm312_vm5, %v1817_v57, %v4451_v19  ;;  %v1799_v6 = vadd.f32 %v1791_v37, %v1750_v53  ;;  %v1839_v48 = vmul.f32 %v3369_v44, %v1820_v59  ;;  %v1868_v21 = vpop.permute.xlu0 %1867  ;;  %v3378_v19 = vld [vmem:[%s5294_s3 + $0x1d8] sm:$0xff]  ;;  %v1866_v58 = vpop.permute.xlu1 %1865  ;;  %v3389_v37 = vld [vmem:[%s5294_s3 + $0x230] sm:$0xff] }
 0x2a6   :  { %v1851_v9 = vadd.f32 %v1843_v40, %v1802_v41  ;;  %v1840_v24 = vmul.f32 %v3370_v51, %v1826_v13  ;;  %2178 = vmatprep.mubr.f32.mxu1 %v5329_v36  ;;  %2265 = vmatprep.mubr.f32.mxu0 %v5329_v36  ;;  %v1870_v32 = vsel %vm362_vm7, %v5355_v15, %v1868_v21  ;;  %v3390_v3 = vld [vmem:[%s5294_s3 + $0x238] sm:$0xff] }
 0x2a7   :  { %v1876_v62 = vsel %vm362_vm7, %v1868_v21, %v4505_v22  ;;  %v1869_v16 = vsel %vm362_vm7, %v5356_v30, %v1866_v58  ;;  %v1875_v26 = vsel %vm362_vm7, %v1866_v58, %v5357_v2  ;;  %v1852_v41 = vadd.f32 %v1844_v63, %v1803_v54  ;;  %2268 = vmatmul.mubr.f32.vlgmr.msra.gmra.mxu0 %v4687_v11  ;;  %v3386_v51 = vld [vmem:[%s5294_s3 + $0x218] sm:$0xff]  ;;  %v5360_v58 = vld [vmem:[#allocation11_spill] sm:$0xff] }
 0x2a8   :  { %v1847_v53 = vadd.f32 %v1839_v48, %v1798_v0  ;;  %v1892_v42 = vmul.f32 %v3381_v25, %v1870_v32  ;;  %v1893_v46 = vmul.f32 %v3382_v61, %v1876_v62  ;;  %v1848_v31 = vadd.f32 %v1840_v24, %v1799_v6  ;;  %2438 = vmatpush1.msra.mxu0 %v5358_v29  ;;  %v5359_v40 = vld [vmem:[#allocation9_spill] sm:$0xff]  ;;  %v5361_v32 = vld [vmem:[#allocation12_spill] sm:$0xff] }
 0x2a9   :  { %2180 = vmatmul.mubr.f32.gmra.mxu1 %v4741_v20  ;;  %v1888_v22 = vmul.f32 %v3377_v33, %v1869_v16  ;;  %v1889_v57 = vmul.f32 %v3378_v19, %v1875_v26  ;;  %2442 = vmatprep.subr.mxu0 %v2122_v8  ;;  %v1917_v44 = vpop.permute.xlu0 %1916  ;;  %v1915_v54 = vpop.permute.xlu1 %1914 }
 0x2aa   :  { %v1900_v34 = vadd.f32 %v1892_v42, %v1851_v9  ;;  %v1901_v10 = vadd.f32 %v1893_v46, %v1852_v41  ;;  %2185 = vmatprep.mubr.f32.mxu1 %v5329_v36  ;;  %2446 = vmatpush1.msra.mxu0 %v2128_v43  ;;  %v1919_v63 = vsel %vm412_vm8, %v5359_v40, %v1917_v44 }
 0x2ab   :  { %v1896_v27 = vadd.f32 %v1888_v22, %v1847_v53  ;;  %v1897_v8 = vadd.f32 %v1889_v57, %v1848_v31  ;;  %2273 = vmatprep.mubr.f32.mxu0 %v5329_v36  ;;  %v1925_v0 = vsel %vm412_vm8, %v1917_v44, %v4792_v55  ;;  %v1941_v59 = vmul.f32 %v3389_v37, %v1919_v63 }
 0x2ac   :  { %2276 = vmatmul.mubr.f32.gmra.mxu0 %v4739_v39  ;;  %v1918_v13 = vsel %vm412_vm8, %v4823_v18, %v1915_v54  ;;  %v1924_v14 = vsel %vm412_vm8, %v1915_v54, %v4825_v23  ;;  %v1942_v43 = vmul.f32 %v3390_v3, %v1925_v0 }
 0x2ad   :  { %2187 = vmatmul.mubr.f32.gmra.mxu1 %v4845_v60  ;;  %v1937_v25 = vmul.f32 %v3385_v50, %v1918_v13  ;;  %v1938_v61 = vmul.f32 %v3386_v51, %v1924_v14  ;;  %2281 = vmatprep.mubr.f32.mxu0 %v5329_v36  ;;  %v1949_v6 = vadd.f32 %v1941_v59, %v1900_v34 }
 0x2ae   :  { %2366 = vmatprep.mubr.f32.mxu1 %v5329_v36  ;;  %v1950_v55 = vadd.f32 %v1942_v43, %v1901_v10 }
 0x2af   :  { %v1945_v9 = vadd.f32 %v1937_v25, %v1896_v27  ;;  %v1946_v48 = vadd.f32 %v1938_v61, %v1897_v8  ;;  %v5127_v24 = vand.u32 4294901760, %v1949_v6 }
 0x2b0   :  { %2284 = vmatmul.mubr.f32.gmra.mxu0 %v4790_v56  ;;  %v5130_v18 = vand.u32 4294901760, %v1950_v55 }
 0x2b1   :  { %v5132_v38 = vand.u32 4294901760, %v1946_v48  ;;  %2370 = vmatmul.mubr.f32.vlgmr.msra.gmra.mxu1 %v4736_v5  ;;  %2289 = vmatprep.mubr.f32.mxu0 %v5329_v36  ;;  %v5136_v23 = vand.u32 4294901760, %v1945_v9  ;;  %v5144_v33 = vsub.f32 %v1949_v6, %v5127_v24 }
 0x2b2   :  { %2539 = vmatpush1.msra.mxu1 %v4847_v17  ;;  %2375 = vmatprep.mubr.f32.mxu1 %v5329_v36  ;;  %v2747_v21 = vsub.f32 %v1950_v55, %v5130_v18 }
 0x2b3   :  { %2541 = vmatprep.subr.mxu1 %v4876_v47  ;;  %2634 = vmatprep.subr.mxu0 %v5130_v18  ;;  %v5149_v19 = vsub.f32 %v1946_v48, %v5132_v38  ;;  %v5154_v47 = vsub.f32 %v1945_v9, %v5136_v23 }
 0x2b4   :  { %2543 = vmatpush1.msra.mxu1 %v4878_v4  ;;  %2292 = vmatmul.mubr.f32.gmra.mxu0 %v4888_v28  ;;  %v2748_v17 = vand.u32 4294901760, %v2747_v21  ;;  %v2754_v4 = vand.u32 4294901760, %v5144_v33 }
 0x2b5   :  { %2379 = vmatmul.mubr.f32.gmra.mxu1 %v5360_v58  ;;  %2479 = vmatprep.mubr.f32.mxu0 %v5329_v36  ;;  %v2760_v30 = vand.u32 4294901760, %v5149_v19  ;;  %v2766_v16 = vand.u32 4294901760, %v5154_v47 }
 0x2b6   :  { %2384 = vmatprep.mubr.f32.mxu1 %v5329_v36  ;;  %v2749_v15 = vsub.f32 %v2747_v21, %v2748_v17  ;;  %v2755_v2 = vsub.f32 %v5144_v33, %v2754_v4 }
 0x2b7   :  { %v2761_v26 = vsub.f32 %v5149_v19, %v2760_v30  ;;  %v2767_v41 = vsub.f32 %v5154_v47, %v2766_v16 }
 0x2b8   :  { %2481 = vmatmul.mubr.f32.vlgmr.msra.gmra.mxu0 %v4642_v45  ;;  %v2750_v62 = vand.u32 4294901760, %v2749_v15  ;;  %v2756_v53 = vand.u32 4294901760, %v2755_v2 }
 0x2b9   :  { %2388 = vmatmul.mubr.f32.gmra.mxu1 %v5361_v32  ;;  %2636 = vmatpush1.msra.mxu0 %v5127_v24  ;;  %v2762_v42 = vand.u32 4294901760, %v2761_v26  ;;  %v2768_v46 = vand.u32 4294901760, %v2767_v41 }
 0x2ba   :  { %2638 = vmatprep.subr.mxu0 %v5132_v38  ;;  %2393 = vmatprep.mubr.f32.mxu1 %v5329_v36 }
 0x2bb   :  { %2640 = vmatpush1.msra.mxu0 %v5136_v23  ;;  %2486 = vmatprep.mubr.f32.mxu0 %v5329_v36 }
 0x2bc   :  { %2861 = vmatprep.subr.mxu0 %v2747_v21  ;;  %2488 = vmatmul.mubr.f32.gmra.mxu0 %v4689_v1 }
 0x2bd   :  { %2397 = vmatmul.mubr.f32.gmra.mxu1 %v4943_v35  ;;  %2751 = vmatprep.subr.mxu1 %v2750_v62 }
 0x2be   :  { %2493 = vmatprep.mubr.f32.mxu0 %v5329_v36  ;;  %2576 = vmatprep.mubr.f32.mxu1 %v5329_v36 }
 0x2c0   :  { %2495 = vmatmul.mubr.f32.gmra.mxu0 %v4741_v20 }
 0x2c1   :  { %2578 = vmatmul.mubr.f32.vlgmr.msra.gmra.mxu1 %v4642_v45  ;;  %2500 = vmatprep.mubr.f32.mxu0 %v5329_v36 }
 0x2c2   :  { %2757 = vmatpush1.msra.mxu1 %v2756_v53  ;;  %2583 = vmatprep.mubr.f32.mxu1 %v5329_v36 }
 0x2c3   :  { %2763 = vmatprep.subr.mxu1 %v2762_v42 }
 0x2c4   :  { %2769 = vmatpush1.msra.mxu1 %v2768_v46  ;;  %2502 = vmatmul.mubr.f32.gmra.mxu0 %v4845_v60 }
 0x2c5   :  { %2965 = vmatprep.subr.mxu1 %v5130_v18  ;;  %2585 = vmatmul.mubr.f32.gmra.mxu1 %v4689_v1 }
 0x2c6   :  { %2590 = vmatprep.mubr.f32.mxu1 %v5329_v36  ;;  %2673 = vmatprep.mubr.f32.mxu0 %v5329_v36 }
 0x2c8   :  { %2679 = vmatmul.mubr.f32.vlgmr.msra.gmra.mxu0 %v4839_v49 }
 0x2c9   :  { %2592 = vmatmul.mubr.f32.gmra.mxu1 %v4741_v20  ;;  %2864 = vmatpush1.msra.mxu0 %v5144_v33 }
 0x2ca   :  { %2867 = vmatprep.subr.mxu0 %v5149_v19  ;;  %2597 = vmatprep.mubr.f32.mxu1 %v5329_v36 }
 0x2cb   :  { %2870 = vmatpush1.msra.mxu0 %v5154_v47  ;;  %2684 = vmatprep.mubr.f32.mxu0 %v5329_v36 }
 0x2cc   :  { %3072 = vmatprep.subr.mxu0 %v2748_v17  ;;  %2690 = vmatmul.mubr.f32.gmra.mxu0 %v4910_v52 }
 0x2cd   :  { %2599 = vmatmul.mubr.f32.gmra.mxu1 %v4845_v60  ;;  %2695 = vmatprep.mubr.f32.mxu0 %v5329_v36 }
 0x2ce   :  { %2802 = vmatprep.mubr.f32.mxu1 %v5329_v36 }
 0x2d0   :  { %2701 = vmatmul.mubr.f32.gmra.mxu0 %v4940_v12 }
 0x2d1   :  { %2804 = vmatmul.mubr.f32.vlgmr.msra.gmra.mxu1 %v4642_v45  ;;  %2706 = vmatprep.mubr.f32.mxu0 %v5329_v36 }
 0x2d2   :  { %2967 = vmatpush1.msra.mxu1 %v5127_v24  ;;  %2809 = vmatprep.mubr.f32.mxu1 %v5329_v36 }
 0x2d3   :  { %2969 = vmatprep.subr.mxu1 %v5132_v38 }
 0x2d4   :  { %2971 = vmatpush1.msra.mxu1 %v5136_v23  ;;  %2712 = vmatmul.mubr.f32.gmra.mxu0 %v5007_v7 }
 0x2d5   :  { %3175 = vmatprep.subr.mxu1 %v5130_v18  ;;  %2811 = vmatmul.mubr.f32.gmra.mxu1 %v4689_v1 }
 0x2d6   :  { %2816 = vmatprep.mubr.f32.mxu1 %v5329_v36  ;;  %2903 = vmatprep.mubr.f32.mxu0 %v5329_v36 }
 0x2d8   :  { %2906 = vmatmul.mubr.f32.vlgmr.msra.gmra.mxu0 %v4687_v11 }
 0x2d9   :  { %2818 = vmatmul.mubr.f32.gmra.mxu1 %v4741_v20  ;;  %3076 = vmatpush1.msra.mxu0 %v2754_v4 }
 0x2da   :  { %3080 = vmatprep.subr.mxu0 %v2760_v30  ;;  %2823 = vmatprep.mubr.f32.mxu1 %v5329_v36 }
 0x2db   :  { %3084 = vmatpush1.msra.mxu0 %v2766_v16  ;;  %2911 = vmatprep.mubr.f32.mxu0 %v5329_v36 }
 0x2dc   :  { %2914 = vmatmul.mubr.f32.gmra.mxu0 %v4739_v39 }
 0x2dd   :  { %2825 = vmatmul.mubr.f32.gmra.mxu1 %v4845_v60  ;;  %2919 = vmatprep.mubr.f32.mxu0 %v5329_v36 }
 0x2de   :  { %3004 = vmatprep.mubr.f32.mxu1 %v5329_v36 }
 0x2e0   :  { %2922 = vmatmul.mubr.f32.gmra.mxu0 %v4790_v56 }
 0x2e1   :  { %3008 = vmatmul.mubr.f32.vlgmr.msra.gmra.mxu1 %v4736_v5  ;;  %2927 = vmatprep.mubr.f32.mxu0 %v5329_v36 }
 0x2e2   :  { %3177 = vmatpush1.msra.mxu1 %v5127_v24  ;;  %3013 = vmatprep.mubr.f32.mxu1 %v5329_v36 }
 0x2e3   :  { %3179 = vmatprep.subr.mxu1 %v5132_v38 }
 0x2e4   :  { %3181 = vmatpush1.msra.mxu1 %v5136_v23  ;;  %2930 = vmatmul.mubr.f32.gmra.mxu0 %v4888_v28 }
 0x2e5   :  { %3017 = vmatmul.mubr.f32.gmra.mxu1 %v5360_v58  ;;  %3117 = vmatprep.mubr.f32.mxu0 %v5329_v36 }
 0x2e6   :  { %3022 = vmatprep.mubr.f32.mxu1 %v5329_v36 }
 0x2e8   :  { %3119 = vmatmul.mubr.f32.vlgmr.msra.gmra.mxu0 %v4642_v45 }
 0x2e9   :  { %3026 = vmatmul.mubr.f32.gmra.mxu1 %v5361_v32  ;;  %3124 = vmatprep.mubr.f32.mxu0 %v5329_v36 }
 0x2ea   :  { %3031 = vmatprep.mubr.f32.mxu1 %v5329_v36 }
 0x2ec   :  { %3126 = vmatmul.mubr.f32.gmra.mxu0 %v4689_v1 }
 0x2ed   :  { %3035 = vmatmul.mubr.f32.gmra.mxu1 %v4943_v35  ;;  %3131 = vmatprep.mubr.f32.mxu0 %v5329_v36 }
 0x2ee   :  { %3214 = vmatprep.mubr.f32.mxu1 %v5329_v36 }
 0x2f0   :  { %3133 = vmatmul.mubr.f32.gmra.mxu0 %v4741_v20 }
 0x2f1   :  { %3216 = vmatmul.mubr.f32.vlgmr.msra.gmra.mxu1 %v4642_v45  ;;  %3138 = vmatprep.mubr.f32.mxu0 %v5329_v36 }
 0x2f2   :  { %3221 = vmatprep.mubr.f32.mxu1 %v5329_v36 }
 0x2f4   :  { %3140 = vmatmul.mubr.f32.gmra.mxu0 %v4845_v60 }
 0x2f5   :  { %3223 = vmatmul.mubr.f32.gmra.mxu1 %v4689_v1 }
 0x2f6   :  { %3228 = vmatprep.mubr.f32.mxu1 %v5329_v36 }
 0x2f9   :  { %3230 = vmatmul.mubr.f32.gmra.mxu1 %v4741_v20 }
 0x2fa   :  { %3235 = vmatprep.mubr.f32.mxu1 %v5329_v36 }
 0x2fd   :  { %3237 = vmatmul.mubr.f32.gmra.mxu1 %v4845_v60 }
 0x353   :  { %v2042_v11 = vpop.f32.mrf.mxu0 }
 0x355   :  { %v2044_v5 = vpop.f32.mrf.mxu0 }
 0x358   :  { %v2053_v39 = vpop.f32.mrf.mxu0 }
 0x35a   :  { %v2055_v45 = vpop.f32.mrf.mxu0 }
 0x35c   :  { %v2064_v56 = vpop.f32.mrf.mxu0 }
 0x35e   :  { %v2066_v49 = vpop.f32.mrf.mxu0 }
 0x361   :  { %v2167_v28 = vpop.f32.mrf.mxu1 }
 0x362   :  { %v2168_v63 = vadd.f32 %v2167_v28, %v2042_v11 }
 0x363   :  { %v2169_v52 = vpop.f32.mrf.mxu1  ;;  %v2075_v12 = vpop.f32.mrf.mxu0 }
 0x364   :  { %v2170_v13 = vadd.f32 %v2169_v52, %v2044_v5 }
 0x365   :  { %v2174_v35 = vpop.f32.mrf.mxu1  ;;  %v2077_v7 = vpop.f32.mrf.mxu0 }
 0x366   :  { %v2175_v61 = vadd.f32 %v2174_v35, %v2053_v39 }
 0x367   :  { %v2176_v1 = vpop.f32.mrf.mxu1  ;;  %v2269_v31 = vpop.f32.mrf.mxu0 }
 0x368   :  { %v2270_v14 = vadd.f32 %v2269_v31, %v2168_v63  ;;  %v2177_v24 = vadd.f32 %v2176_v1, %v2055_v45 }
 0x369   :  { %v2181_v29 = vpop.f32.mrf.mxu1  ;;  %v2271_v22 = vpop.f32.mrf.mxu0 }
 0x36a   :  { %v2272_v6 = vadd.f32 %v2271_v22, %v2170_v13  ;;  %v2182_v33 = vadd.f32 %v2181_v29, %v2064_v56 }
 0x36b   :  { %v2183_v20 = vpop.f32.mrf.mxu1 }
 0x36c   :  { %v2277_v57 = vpop.f32.mrf.mxu0  ;;  %v2184_v32 = vadd.f32 %v2183_v20, %v2066_v49 }
 0x36d   :  { %v2188_v36 = vpop.f32.mrf.mxu1  ;;  %v2278_v18 = vadd.f32 %v2277_v57, %v2175_v61 }
 0x36e   :  { %v2279_v37 = vpop.f32.mrf.mxu0  ;;  %v2189_v53 = vadd.f32 %v2188_v36, %v2075_v12 }
 0x36f   :  { %v2190_v60 = vpop.f32.mrf.mxu1  ;;  %v2280_v58 = vadd.f32 %v2279_v37, %v2177_v24 }
 0x370   :  { %v2285_v34 = vpop.f32.mrf.mxu0  ;;  %v2191_v56 = vadd.f32 %v2190_v60, %v2077_v7 }
 0x371   :  { %v2371_v10 = vpop.f32.mrf.mxu1  ;;  %v2286_v30 = vadd.f32 %v2285_v34, %v2182_v33 }
 0x372   :  { %v2287_v3 = vpop.f32.mrf.mxu0  ;;  %v2372_v55 = vadd.f32 %v2371_v10, %v2270_v14 }
 0x373   :  { %v2373_v44 = vpop.f32.mrf.mxu1  ;;  %v2288_v46 = vadd.f32 %v2287_v3, %v2184_v32 }
 0x374   :  { %v2293_v50 = vpop.f32.mrf.mxu0  ;;  %v2374_v38 = vadd.f32 %v2373_v44, %v2272_v6 }
 0x375   :  { %v2380_v51 = vpop.f32.mrf.mxu1  ;;  %v2294_v28 = vadd.f32 %v2293_v50, %v2189_v53 }
 0x376   :  { %v2295_v54 = vpop.f32.mrf.mxu0  ;;  %v2381_v17 = vadd.f32 %v2380_v51, %v2278_v18 }
 0x377   :  { %v2382_v27 = vpop.f32.mrf.mxu1  ;;  %v2296_v29 = vadd.f32 %v2295_v54, %v2191_v56 }
 0x378   :  { %v2482_v8 = vpop.f32.mrf.mxu0  ;;  %v2383_v16 = vadd.f32 %v2382_v27, %v2280_v58 }
 0x379   :  { %v2389_v40 = vpop.f32.mrf.mxu1  ;;  %v2483_v23 = vadd.f32 %v2482_v8, %v2372_v55 }
 0x37a   :  { %v2484_v0 = vpop.f32.mrf.mxu0  ;;  %v2390_v11 = vadd.f32 %v2389_v40, %v2286_v30 }
 0x37b   :  { %v2391_v59 = vpop.f32.mrf.mxu1  ;;  %v2485_v47 = vadd.f32 %v2484_v0, %v2374_v38 }
 0x37c   :  { %v2489_v43 = vpop.f32.mrf.mxu0  ;;  %v2392_v52 = vadd.f32 %v2391_v59, %v2288_v46 }
 0x37d   :  { %v2398_v25 = vpop.f32.mrf.mxu1  ;;  %v2490_v2 = vadd.f32 %v2489_v43, %v2381_v17 }
 0x37e   :  { %v2491_v9 = vpop.f32.mrf.mxu0  ;;  %v2399_v22 = vadd.f32 %v2398_v25, %v2294_v28 }
 0x37f   :  { %v2400_v48 = vpop.f32.mrf.mxu1  ;;  %v2492_v5 = vadd.f32 %v2491_v9, %v2383_v16 }
 0x380   :  { %v2496_v21 = vpop.f32.mrf.mxu0  ;;  %v2401_v37 = vadd.f32 %v2400_v48, %v2296_v29 }
 0x381   :  { %v2579_v19 = vpop.f32.mrf.mxu1  ;;  %v2497_v35 = vadd.f32 %v2496_v21, %v2390_v11 }
 0x382   :  { %v2580_v15 = vadd.f32 %v2579_v19, %v2483_v23  ;;  %v2498_v4 = vpop.f32.mrf.mxu0 }
 0x383   :  { %v2581_v62 = vpop.f32.mrf.mxu1  ;;  %v2499_v20 = vadd.f32 %v2498_v4, %v2392_v52 }
 0x384   :  { %3243 = vst [vmem:[%s5296_s5] sm:$0xff] %v2580_v15  ;;  %v2582_v26 = vadd.f32 %v2581_v62, %v2485_v47  ;;  %v2503_v41 = vpop.f32.mrf.mxu0 }
 0x385   :  { %v2586_v42 = vpop.f32.mrf.mxu1  ;;  %v2504_v60 = vadd.f32 %v2503_v41, %v2399_v22 }
 0x386   :  { %3244 = vst [vmem:[%s5296_s5 + $0x8] sm:$0xff] %v2582_v26  ;;  %v2587_v39 = vadd.f32 %v2586_v42, %v2490_v2  ;;  %v2505_v45 = vpop.f32.mrf.mxu0 }
 0x387   :  { %v2588_v49 = vpop.f32.mrf.mxu1  ;;  %v2506_v44 = vadd.f32 %v2505_v45, %v2401_v37 }
 0x388   :  { %3247 = vst [vmem:[%s5296_s5 + $0x20] sm:$0xff] %v2587_v39  ;;  %v2589_v12 = vadd.f32 %v2588_v49, %v2492_v5  ;;  %v2680_v1 = vpop.f32.mrf.mxu0 }
 0x389   :  { %v2593_v31 = vpop.f32.mrf.mxu1 }
 0x38a   :  { %3248 = vst [vmem:[%s5296_s5 + $0x28] sm:$0xff] %v2589_v12  ;;  %v2594_v57 = vadd.f32 %v2593_v31, %v2497_v35  ;;  %v2682_v7 = vpop.f32.mrf.mxu0 }
 0x38b   :  { %v2595_v36 = vpop.f32.mrf.mxu1 }
 0x38c   :  { %3251 = vst [vmem:[%s5296_s5 + $0x40] sm:$0xff] %v2594_v57  ;;  %v2596_v34 = vadd.f32 %v2595_v36, %v2499_v20  ;;  %v2691_v10 = vpop.f32.mrf.mxu0 }
 0x38d   :  { %v2600_v3 = vpop.f32.mrf.mxu1 }
 0x38e   :  { %3252 = vst [vmem:[%s5296_s5 + $0x48] sm:$0xff] %v2596_v34  ;;  %v2601_v50 = vadd.f32 %v2600_v3, %v2504_v60  ;;  %v2693_v51 = vpop.f32.mrf.mxu0 }
 0x38f   :  { %v2602_v54 = vpop.f32.mrf.mxu1 }
 0x390   :  { %3255 = vst [vmem:[%s5296_s5 + $0x60] sm:$0xff] %v2601_v50  ;;  %v2603_v27 = vadd.f32 %v2602_v54, %v2506_v44  ;;  %v2702_v8 = vpop.f32.mrf.mxu0 }
 0x391   :  { %v2805_v40 = vpop.f32.mrf.mxu1 }
 0x392   :  { %3256 = vst [vmem:[%s5296_s5 + $0x68] sm:$0xff] %v2603_v27  ;;  %v2704_v63 = vpop.f32.mrf.mxu0  ;;  %v2806_v32 = vadd.f32 %v2805_v40, %v2680_v1 }
 0x393   :  { %v2807_v0 = vpop.f32.mrf.mxu1 }
 0x394   :  { %v2713_v59 = vpop.f32.mrf.mxu0  ;;  %v2808_v16 = vadd.f32 %v2807_v0, %v2682_v7 }
 0x395   :  { %v2812_v13 = vpop.f32.mrf.mxu1 }
 0x396   :  { %v2715_v14 = vpop.f32.mrf.mxu0  ;;  %v2813_v53 = vadd.f32 %v2812_v13, %v2691_v10 }
 0x397   :  { %v2814_v43 = vpop.f32.mrf.mxu1 }
 0x398   :  { %v2907_v25 = vpop.f32.mrf.mxu0  ;;  %v2815_v39 = vadd.f32 %v2814_v43, %v2693_v51 }
 0x399   :  { %v2819_v61 = vpop.f32.mrf.mxu1  ;;  %v2908_v2 = vadd.f32 %v2907_v25, %v2806_v32 }
 0x39a   :  { %v2909_v6 = vpop.f32.mrf.mxu0  ;;  %v2820_v52 = vadd.f32 %v2819_v61, %v2702_v8 }
 0x39b   :  { %v2821_v55 = vpop.f32.mrf.mxu1  ;;  %v2910_v42 = vadd.f32 %v2909_v6, %v2808_v16 }
 0x39c   :  { %v2915_v9 = vpop.f32.mrf.mxu0  ;;  %v2822_v22 = vadd.f32 %v2821_v55, %v2704_v63 }
 0x39d   :  { %v2826_v48 = vpop.f32.mrf.mxu1  ;;  %v2916_v45 = vadd.f32 %v2915_v9, %v2813_v53 }
 0x39e   :  { %v2917_v24 = vpop.f32.mrf.mxu0  ;;  %v2827_v34 = vadd.f32 %v2826_v48, %v2713_v59 }
 0x39f   :  { %v2828_v18 = vpop.f32.mrf.mxu1  ;;  %v2918_v12 = vadd.f32 %v2917_v24, %v2815_v39 }
 0x3a0   :  { %v2923_v38 = vpop.f32.mrf.mxu0  ;;  %v2829_v54 = vadd.f32 %v2828_v18, %v2715_v14 }
 0x3a1   :  { %v3009_v23 = vpop.f32.mrf.mxu1  ;;  %v2924_v7 = vadd.f32 %v2923_v38, %v2820_v52 }
 0x3a2   :  { %v2925_v21 = vpop.f32.mrf.mxu0  ;;  %v3010_v46 = vadd.f32 %v3009_v23, %v2908_v2 }
 0x3a3   :  { %v3011_v33 = vpop.f32.mrf.mxu1  ;;  %v2926_v3 = vadd.f32 %v2925_v21, %v2822_v22 }
 0x3a4   :  { %v2931_v19 = vpop.f32.mrf.mxu0  ;;  %v3012_v56 = vadd.f32 %v3011_v33, %v2910_v42 }
 0x3a5   :  { %v3018_v58 = vpop.f32.mrf.mxu1  ;;  %v2932_v40 = vadd.f32 %v2931_v19, %v2827_v34 }
 0x3a6   :  { %v2933_v17 = vpop.f32.mrf.mxu0  ;;  %v3019_v1 = vadd.f32 %v3018_v58, %v2916_v45 }
 0x3a7   :  { %v3020_v47 = vpop.f32.mrf.mxu1  ;;  %v2934_v43 = vadd.f32 %v2933_v17, %v2829_v54 }
 0x3a8   :  { %v3120_v15 = vpop.f32.mrf.mxu0  ;;  %v3021_v36 = vadd.f32 %v3020_v47, %v2918_v12 }
 0x3a9   :  { %v3027_v4 = vpop.f32.mrf.mxu1  ;;  %v3121_v49 = vadd.f32 %v3120_v15, %v3010_v46 }
 0x3aa   :  { %v3122_v62 = vpop.f32.mrf.mxu0  ;;  %v3028_v44 = vadd.f32 %v3027_v4, %v2924_v7 }
 0x3ab   :  { %v3029_v30 = vpop.f32.mrf.mxu1  ;;  %v3123_v31 = vadd.f32 %v3122_v62, %v3012_v56 }
 0x3ac   :  { %v3127_v26 = vpop.f32.mrf.mxu0  ;;  %v3030_v63 = vadd.f32 %v3029_v30, %v2926_v3 }
 0x3ad   :  { %v3036_v41 = vpop.f32.mrf.mxu1  ;;  %v3128_v37 = vadd.f32 %v3127_v26, %v3019_v1 }
 0x3ae   :  { %v3129_v11 = vpop.f32.mrf.mxu0  ;;  %v3037_v25 = vadd.f32 %v3036_v41, %v2932_v40 }
 0x3af   :  { %v3038_v5 = vpop.f32.mrf.mxu1  ;;  %v3130_v50 = vadd.f32 %v3129_v11, %v3021_v36 }
 0x3b0   :  { %v3134_v28 = vpop.f32.mrf.mxu0  ;;  %v3039_v9 = vadd.f32 %v3038_v5, %v2934_v43 }
 0x3b1   :  { %v3217_v35 = vpop.f32.mrf.mxu1  ;;  %v3135_v0 = vadd.f32 %v3134_v28, %v3028_v44 }
 0x3b2   :  { %v3218_v29 = vadd.f32 %v3217_v35, %v3121_v49  ;;  %v3136_v20 = vpop.f32.mrf.mxu0 }
 0x3b3   :  { %v3219_v57 = vpop.f32.mrf.mxu1  ;;  %v3137_v61 = vadd.f32 %v3136_v20, %v3030_v63 }
 0x3b4   :  { %3245 = vst [vmem:[%s5296_s5 + $0x10] sm:$0xff] %v3218_v29  ;;  %v3220_v60 = vadd.f32 %v3219_v57, %v3123_v31  ;;  %v3141_v27 = vpop.f32.mrf.mxu0 }
 0x3b5   :  { %v3224_v10 = vpop.f32.mrf.mxu1  ;;  %v3142_v48 = vadd.f32 %v3141_v27, %v3037_v25 }
 0x3b6   :  { %3246 = vst [vmem:[%s5296_s5 + $0x18] sm:$0xff] %v3220_v60  ;;  %v3225_v51 = vadd.f32 %v3224_v10, %v3128_v37  ;;  %v3143_v14 = vpop.f32.mrf.mxu0 }
 0x3b7   :  { %v3226_v8 = vpop.f32.mrf.mxu1  ;;  %v3144_v38 = vadd.f32 %v3143_v14, %v3039_v9 }
 0x3b8   :  { %3249 = vst [vmem:[%s5296_s5 + $0x30] sm:$0xff] %v3225_v51  ;;  %v3227_v59 = vadd.f32 %v3226_v8, %v3130_v50 }
 0x3b9   :  { %v3231_v13 = vpop.f32.mrf.mxu1 }
 0x3ba   :  { %3250 = vst [vmem:[%s5296_s5 + $0x38] sm:$0xff] %v3227_v59  ;;  %v3232_v6 = vadd.f32 %v3231_v13, %v3135_v0 }
 0x3bb   :  { %v3233_v55 = vpop.f32.mrf.mxu1 }
 0x3bc   :  { %3253 = vst [vmem:[%s5296_s5 + $0x50] sm:$0xff] %v3232_v6  ;;  %v3234_v24 = vadd.f32 %v3233_v55, %v3137_v61 }
 0x3bd   :  { %v3238_v18 = vpop.f32.mrf.mxu1 }
 0x3be   :  { %3254 = vst [vmem:[%s5296_s5 + $0x58] sm:$0xff] %v3234_v24  ;;  %v3239_v23 = vadd.f32 %v3238_v18, %v3142_v48 }
 0x3bf   :  { %v3240_v21 = vpop.f32.mrf.mxu1 }
 0x3c0   :  { %3257 = vst [vmem:[%s5296_s5 + $0x70] sm:$0xff] %v3239_v23  ;;  %v3241_v33 = vadd.f32 %v3240_v21, %v3144_v38 }
 0x3c2   :  { %3258 = vst [vmem:[%s5296_s5 + $0x78] sm:$0xff] %v3241_v33 }

</bundles_post_ra>
